<compile_context>
chip_gen: v5e
topology: v5e:2x2
jax: 0.10.0
libtpu: 0.0.40
codegen_flags: <defaults>
</compile_context>

<pallas_src>
import functools
import math

import jax
import jax.numpy as jnp
from jax.experimental import pallas as pl
from jax.experimental.pallas import tpu as pltpu

_LANE = 128


def _pick_t_blk(T, B, I, H, *, max_unrolled_steps=64, vmem_budget_bytes=4 << 20):
    """Steps packed per grid iteration.

    Chosen so that (a) the packed output slab is lane-dense (t_blk*H is a
    multiple of 128 -> unmasked HBM writeback), (b) the per-grid-step working
    set (x slab + Z + Z@Uz + output slab) stays a few MiB (safe under v7x's
    smaller 64 MiB VMEM as well as v5e/v6e), and (c) the static unroll of the
    serial recurrence stays bounded.
    """
    unit = _LANE // math.gcd(H, _LANE)          # smallest lane-dense step count
    bytes_per_step = B * (I + 3 * H) * 4        # x + z + z@Uz + out, f32-ish
    cap = max(unit, vmem_budget_bytes // max(bytes_per_step, 1))
    cap = min(cap, max_unrolled_steps)
    cap = max(unit, (cap // unit) * unit)       # keep cap lane-dense
    return min(pl.cdiv(T, unit) * unit, cap)


def _seq_kernel(x_ref, hx0_ref, wt_ref, wb_ref, uh_ref, uz_ref, bh_ref,
                out_ref, h_state, *, t_blk, B, H):
    # Seed the VMEM-carried hidden state at the start of every sequence.
    @pl.when(pl.program_id(1) == 0)
    def _():
        h_state[...] = hx0_ref[...]

    mdt = wt_ref.dtype  # MXU operand dtype for the non-recurrent matmuls

    # ---- Hoisted, non-recurrent work: two big (t_blk*B)-row matmuls. ----
    # Z = tanh(X @ Wt + Wb) for every packed step at once (x already in mdt).
    z_all = jnp.tanh(
        jnp.dot(x_ref[...], wt_ref[...], preferred_element_type=jnp.float32)
        + wb_ref[...])
    # Z @ Uz + bias_hh for every packed step at once (bias folded here, so no
    # per-step broadcast inside the serial loop).
    zuz_all = (
        jnp.dot(z_all.astype(mdt), uz_ref[...],
                preferred_element_type=jnp.float32)
        + bh_ref[...])

    uh = uh_ref[...]          # kept f32 -> exact recurrent path, no drift
    h = h_state[...]          # f32 carried state

    # ---- Serial recurrence: 1 small matmul + sigmoid + blend per step. ----
    for j in range(t_blk):    # static unroll; all slice offsets are static
        row = j * B
        z_j = z_all[row:row + B, :]
        u = jax.nn.sigmoid(
            zuz_all[row:row + B, :]
            + jnp.dot(h, uh, preferred_element_type=jnp.float32))
        h = u * h + (1.0 - u) * z_j
        out_ref[:, pl.ds(j * H, H)] = h   # stage into the VMEM output slab
    h_state[...] = h


def minimal_rnn_cell_seq(xs, hx0, Wt, Wb, Uh, Uz, bh, *, use_bf16=True):
    """Run MinimalRNNCell over sequences.

    xs:  (S, T, B, I) inputs        hx0: (S, B, H) initial hidden states
    Wt:  (I, H) = W.weight.T        Wb:  (H,) = W.bias
    Uh, Uz: (H, H)                  bh:  (H,) = bias_hh
    Returns hs: (S, T, B, H) float32 (hidden state after each step).
    """
    S, T, B, I = xs.shape
    H = hx0.shape[-1]

    t_blk = _pick_t_blk(T, B, I, H)
    n_blk = pl.cdiv(T, t_blk)
    Tp = n_blk * t_blk
    if Tp != T:  # pad trailing steps; padded results are sliced off below and
        # the polluted final h_state is never exposed.
        xs = jnp.pad(xs, ((0, 0), (0, Tp - T), (0, 0), (0, 0)))

    mdt = jnp.bfloat16 if use_bf16 else jnp.float32
    # x is only ever an MXU LHS -> ship it in the MXU dtype (halves the only
    # streaming HBM->VMEM DMA in bf16 mode), folded to a (t_blk*B, I) slab.
    xs = xs.reshape(S, n_blk, t_blk * B, I).astype(mdt)
    hx0 = hx0.astype(jnp.float32)
    wt = Wt.astype(mdt)
    uz = Uz.astype(mdt)
    uh = Uh.astype(jnp.float32)              # recurrent matmul stays f32
    wb2 = Wb.reshape(1, H).astype(jnp.float32)
    bh2 = bh.reshape(1, H).astype(jnp.float32)

    kernel = functools.partial(_seq_kernel, t_blk=t_blk, B=B, H=H)

    out_packed = pl.pallas_call(
        kernel,
        out_shape=jax.ShapeDtypeStruct((S, n_blk, B, t_blk * H), jnp.float32),
        grid=(S, n_blk),
        in_specs=[
            # Streaming input: one (t_blk*B, I) slab per grid step.
            pl.BlockSpec((None, None, t_blk * B, I), lambda s, t: (s, t, 0, 0)),
            # Initial hidden state, constant along the time axis per sequence.
            pl.BlockSpec((None, B, H), lambda s, t: (s, 0, 0)),
            # Weights / biases: constant index_maps -> DMA'd once, VMEM-resident.
            pl.BlockSpec((I, H), lambda s, t: (0, 0)),
            pl.BlockSpec((1, H), lambda s, t: (0, 0)),
            pl.BlockSpec((H, H), lambda s, t: (0, 0)),
            pl.BlockSpec((H, H), lambda s, t: (0, 0)),
            pl.BlockSpec((1, H), lambda s, t: (0, 0)),
        ],
        # Lane-dense packed output slab (t_blk*H is a multiple of 128).
        out_specs=pl.BlockSpec((None, None, B, t_blk * H),
                               lambda s, t: (s, t, 0, 0)),
        scratch_shapes=[pltpu.VMEM((B, H), jnp.float32)],
        compiler_params=pltpu.CompilerParams(
            # s axis parallel (megacore / both v7x TCs); time axis carries the
            # VMEM h_state so it must stay "arbitrary" and in order.
            dimension_semantics=("parallel", "arbitrary"),
            vmem_limit_bytes=32 << 20),
    )(xs, hx0, wt, wb2, uh, uz, bh2)

    # Unpack (S, n_blk, B, t_blk*H) -> (S, T, B, H).  Negligible at demo size;
    # at scale, consumers could read the packed layout directly instead.
    hs = out_packed.reshape(S, n_blk, B, t_blk, H)
    hs = hs.transpose(0, 1, 3, 2, 4).reshape(S, Tp, B, H)
    return hs[:, :T]


def minimal_rnn_cell(x, hx, Wt, Wb, Uh, Uz, bh, *, use_bf16=False):
    """Single-step forward matching the PyTorch module's signature exactly.
    x: (B, I); hx: (B, H) -> h': (B, H)."""
    hs = minimal_rnn_cell_seq(x[None, None], hx[None], Wt, Wb, Uh, Uz, bh,
                              use_bf16=use_bf16)
    return hs[0, 0]


# ------------------------- pure-JAX references -------------------------

def _reference_step(x, h, Wt, Wb, Uh, Uz, bh):
    z = jnp.tanh(x @ Wt + Wb)
    u = jax.nn.sigmoid(bh + h @ Uh + z @ Uz)
    return u * h + (1.0 - u) * z


def _reference_seq(xs, hx0, Wt, Wb, Uh, Uz, bh):
    def body(h, x):
        h = _reference_step(x, h, Wt, Wb, Uh, Uz, bh)
        return h, h
    _, hs = jax.lax.scan(body, hx0, xs)
    return hs


if __name__ == "__main__":
    # Small shapes consistent with the module:
    # 2 independent sequences, 16 steps, batch=8, input_size=16, hidden=32.
    S, T, B, I, H = 2, 16, 8, 16, 32
    key = jax.random.PRNGKey(0)
    kx, kh, kw, kwb, kuh, kuz, kbh = jax.random.split(key, 7)

    stdv = 1.0 / jnp.sqrt(jnp.float32(H))
    xs = jax.random.normal(kx, (S, T, B, I), dtype=jnp.float32)
    hx0 = jax.random.normal(kh, (S, B, H), dtype=jnp.float32)

    # nn.Linear(input_size, hidden_size): weight (H, I), bias (H,); store W^T.
    Wt = jax.random.uniform(kw, (I, H), jnp.float32, -stdv, stdv)
    Wb = jax.random.uniform(kwb, (H,), jnp.float32, -stdv, stdv)
    Uh = jax.random.uniform(kuh, (H, H), jnp.float32, -stdv, stdv)
    Uz = jax.random.uniform(kuz, (H, H), jnp.float32, -stdv, stdv)
    bh = jax.random.uniform(kbh, (H,), jnp.float32, stdv, 1.0)  # .uniform_(stdv)

    ref_seq = jax.vmap(
        lambda x, h: _reference_seq(x, h, Wt, Wb, Uh, Uz, bh))(xs, hx0)

    # 1) Exact-math path (f32 MXU operands) vs reference scan.
    out_f32 = jax.block_until_ready(
        minimal_rnn_cell_seq(xs, hx0, Wt, Wb, Uh, Uz, bh, use_bf16=False))
    assert out_f32.shape == (S, T, B, H)
    assert jnp.allclose(out_f32, ref_seq, atol=1e-5, rtol=1e-5), \
        "f32 sequence kernel mismatch vs JAX reference"

    # 2) Perf path: bf16 x/Wt/Uz, f32 recurrent h@Uh, f32 activations/blend.
    out_bf16 = jax.block_until_ready(
        minimal_rnn_cell_seq(xs, hx0, Wt, Wb, Uh, Uz, bh, use_bf16=True))
    assert jnp.allclose(out_bf16, ref_seq, atol=5e-2, rtol=5e-2), \
        "bf16-operand sequence kernel mismatch vs JAX reference"

    # 3) Single-step forward (the PyTorch module's forward signature).
    x0, h0 = xs[0, 0], hx0[0]
    out_step = jax.block_until_ready(
        minimal_rnn_cell(x0, h0, Wt, Wb, Uh, Uz, bh))
    ref_step = _reference_step(x0, h0, Wt, Wb, Uh, Uz, bh)
    assert out_step.shape == (B, H)
    assert jnp.allclose(out_step, ref_step, atol=1e-5, rtol=1e-5), \
        "single-step kernel mismatch vs JAX reference"

    print("KERNEL_OK")
</pallas_src>

<mosaic_0001>
module attributes {stable_mosaic.version = 11 : i64} {
  func.func @_seq_kernel(%arg0: i32, %arg1: i32, %arg2: memref<1x1x128x16xf32, #tpu.memory_space<vmem>>, %arg3: memref<1x8x32xf32, #tpu.memory_space<vmem>>, %arg4: memref<16x32xf32, #tpu.memory_space<vmem>>, %arg5: memref<1x32xf32, #tpu.memory_space<vmem>>, %arg6: memref<32x32xf32, #tpu.memory_space<vmem>>, %arg7: memref<32x32xf32, #tpu.memory_space<vmem>>, %arg8: memref<1x32xf32, #tpu.memory_space<vmem>>, %arg9: memref<1x1x8x512xf32, #tpu.memory_space<vmem>>, %arg10: memref<8x32xf32, #tpu.memory_space<vmem>>) attributes {dimension_semantics = [#tpu.dimension_semantics<parallel>, #tpu.dimension_semantics<arbitrary>], iteration_bounds = array<i64: 2, 1>, scalar_prefetch = 0 : i64, scratch_operands = 1 : i64, tpu.core_type = #tpu.core_type<tc>, window_params = [{transform_indices = @transform_0, window_bounds = array<i64: 1, 1, 128, 16>}, {transform_indices = @transform_1, window_bounds = array<i64: 1, 8, 32>}, {pipeline_mode = #tpu.pipeline_mode<synchronous>, transform_indices = @transform_2, window_bounds = array<i64: 16, 32>}, {pipeline_mode = #tpu.pipeline_mode<synchronous>, transform_indices = @transform_3, window_bounds = array<i64: 1, 32>}, {pipeline_mode = #tpu.pipeline_mode<synchronous>, transform_indices = @transform_4, window_bounds = array<i64: 32, 32>}, {pipeline_mode = #tpu.pipeline_mode<synchronous>, transform_indices = @transform_5, window_bounds = array<i64: 32, 32>}, {pipeline_mode = #tpu.pipeline_mode<synchronous>, transform_indices = @transform_6, window_bounds = array<i64: 1, 32>}, {transform_indices = @transform_7, window_bounds = array<i64: 1, 1, 8, 512>}]} {
    %c0_i32 = arith.constant 0 : i32
    %0 = arith.cmpi eq, %arg1, %c0_i32 : i32
    %1 = arith.extui %0 : i1 to i32
    %c0_i32_0 = arith.constant 0 : i32
    %2 = arith.cmpi ne, %1, %c0_i32_0 : i32
    scf.if %2 {
      %c0_116 = arith.constant 0 : index
      %c0_117 = arith.constant 0 : index
      %c0_118 = arith.constant 0 : index
      %291 = vector.load %arg3[%c0_116, %c0_117, %c0_118] : memref<1x8x32xf32, #tpu.memory_space<vmem>>, vector<1x8x32xf32>
      %292 = vector.shape_cast %291 : vector<1x8x32xf32> to vector<8x32xf32>
      %c0_119 = arith.constant 0 : index
      %c0_120 = arith.constant 0 : index
      %293 = vector.load %arg10[%c0_119, %c0_120] : memref<8x32xf32, #tpu.memory_space<vmem>>, vector<8x32xf32>
      tpu.vector_store %arg10[%c0_119, %c0_120], %292 {strides = array<i32>} : memref<8x32xf32, #tpu.memory_space<vmem>>, vector<8x32xf32>,
    } else {
    }
    %c0 = arith.constant 0 : index
    %c0_1 = arith.constant 0 : index
    %c0_2 = arith.constant 0 : index
    %c0_3 = arith.constant 0 : index
    %3 = vector.load %arg2[%c0, %c0_1, %c0_2, %c0_3] : memref<1x1x128x16xf32, #tpu.memory_space<vmem>>, vector<1x1x128x16xf32>
    %4 = vector.shape_cast %3 : vector<1x1x128x16xf32> to vector<128x16xf32>
    %c0_4 = arith.constant 0 : index
    %c0_5 = arith.constant 0 : index
    %5 = vector.load %arg4[%c0_4, %c0_5] : memref<16x32xf32, #tpu.memory_space<vmem>>, vector<16x32xf32>
    %cst = arith.constant dense<0.000000e+00> : vector<128x32xf32>
    %6 = tpu.matmul %4, %5, %cst {dimension_numbers = #tpu.dot_dimension_numbers<[1], [0], [0], [1], [0, 0, 1, 1], [], []>} : vector<128x16xf32>, vector<16x32xf32>, vector<128x32xf32> -> vector<128x32xf32>
    %c0_6 = arith.constant 0 : index
    %c0_7 = arith.constant 0 : index
    %7 = vector.load %arg5[%c0_6, %c0_7] : memref<1x32xf32, #tpu.memory_space<vmem>>, vector<1x32xf32>
    %8 = vector.broadcast %7 : vector<1x32xf32> to vector<128x32xf32>
    %9 = arith.addf %6, %8 : vector<128x32xf32>
    %10 = math.tanh %9 : vector<128x32xf32>
    %c0_8 = arith.constant 0 : index
    %c0_9 = arith.constant 0 : index
    %11 = vector.load %arg7[%c0_8, %c0_9] : memref<32x32xf32, #tpu.memory_space<vmem>>, vector<32x32xf32>
    %cst_10 = arith.constant dense<0.000000e+00> : vector<128x32xf32>
    %12 = tpu.matmul %10, %11, %cst_10 {dimension_numbers = #tpu.dot_dimension_numbers<[1], [0], [0], [1], [0, 0, 1, 1], [], []>} : vector<128x32xf32>, vector<32x32xf32>, vector<128x32xf32> -> vector<128x32xf32>
    %c0_11 = arith.constant 0 : index
    %c0_12 = arith.constant 0 : index
    %13 = vector.load %arg8[%c0_11, %c0_12] : memref<1x32xf32, #tpu.memory_space<vmem>>, vector<1x32xf32>
    %14 = vector.broadcast %13 : vector<1x32xf32> to vector<128x32xf32>
    %15 = arith.addf %12, %14 : vector<128x32xf32>
    %c0_13 = arith.constant 0 : index
    %c0_14 = arith.constant 0 : index
    %16 = vector.load %arg6[%c0_13, %c0_14] : memref<32x32xf32, #tpu.memory_space<vmem>>, vector<32x32xf32>
    %c0_15 = arith.constant 0 : index
    %c0_16 = arith.constant 0 : index
    %17 = vector.load %arg10[%c0_15, %c0_16] : memref<8x32xf32, #tpu.memory_space<vmem>>, vector<8x32xf32>
    %18 = vector.extract_strided_slice %10 {offsets = [0, 0], sizes = [8, 32], strides = [1, 1]} : vector<128x32xf32> to vector<8x32xf32>
    %19 = vector.extract_strided_slice %15 {offsets = [0, 0], sizes = [8, 32], strides = [1, 1]} : vector<128x32xf32> to vector<8x32xf32>
    %cst_17 = arith.constant dense<0.000000e+00> : vector<8x32xf32>
    %20 = tpu.matmul %17, %16, %cst_17 {dimension_numbers = #tpu.dot_dimension_numbers<[1], [0], [0], [1], [0, 0, 1, 1], [], []>} : vector<8x32xf32>, vector<32x32xf32>, vector<8x32xf32> -> vector<8x32xf32>
    %21 = arith.addf %19, %20 : vector<8x32xf32>
    %22 = arith.negf %21 : vector<8x32xf32>
    %23 = math.exp %22 : vector<8x32xf32>
    %cst_18 = arith.constant 1.000000e+00 : f32
    %24 = vector.broadcast %cst_18 : f32 to vector<8x32xf32>
    %25 = arith.addf %24, %23 : vector<8x32xf32>
    %26 = arith.divf %24, %25 : vector<8x32xf32>
    %27 = arith.mulf %26, %17 : vector<8x32xf32>
    %cst_19 = arith.constant 1.000000e+00 : f32
    %28 = vector.broadcast %cst_19 : f32 to vector<8x32xf32>
    %29 = arith.subf %28, %26 : vector<8x32xf32>
    %30 = arith.mulf %29, %18 : vector<8x32xf32>
    %31 = arith.addf %27, %30 : vector<8x32xf32>
    %c0_20 = arith.constant 0 : index
    %c0_21 = arith.constant 0 : index
    %c0_22 = arith.constant 0 : index
    %c0_23 = arith.constant 0 : index
    %32 = vector.load %arg9[%c0_20, %c0_21, %c0_22, %c0_23] : memref<1x1x8x512xf32, #tpu.memory_space<vmem>>, vector<1x1x8x32xf32>
    %33 = vector.shape_cast %32 : vector<1x1x8x32xf32> to vector<8x32xf32>
    %34 = vector.shape_cast %31 : vector<8x32xf32> to vector<1x1x8x32xf32>
    tpu.vector_store %arg9[%c0_20, %c0_21, %c0_22, %c0_23], %34 {strides = array<i32>} : memref<1x1x8x512xf32, #tpu.memory_space<vmem>>, vector<1x1x8x32xf32>,
    %35 = vector.extract_strided_slice %10 {offsets = [8, 0], sizes = [8, 32], strides = [1, 1]} : vector<128x32xf32> to vector<8x32xf32>
    %36 = vector.extract_strided_slice %15 {offsets = [8, 0], sizes = [8, 32], strides = [1, 1]} : vector<128x32xf32> to vector<8x32xf32>
    %cst_24 = arith.constant dense<0.000000e+00> : vector<8x32xf32>
    %37 = tpu.matmul %31, %16, %cst_24 {dimension_numbers = #tpu.dot_dimension_numbers<[1], [0], [0], [1], [0, 0, 1, 1], [], []>} : vector<8x32xf32>, vector<32x32xf32>, vector<8x32xf32> -> vector<8x32xf32>
    %38 = arith.addf %36, %37 : vector<8x32xf32>
    %39 = arith.negf %38 : vector<8x32xf32>
    %40 = math.exp %39 : vector<8x32xf32>
    %cst_25 = arith.constant 1.000000e+00 : f32
    %41 = vector.broadcast %cst_25 : f32 to vector<8x32xf32>
    %42 = arith.addf %41, %40 : vector<8x32xf32>
    %43 = arith.divf %41, %42 : vector<8x32xf32>
    %44 = arith.mulf %43, %31 : vector<8x32xf32>
    %cst_26 = arith.constant 1.000000e+00 : f32
    %45 = vector.broadcast %cst_26 : f32 to vector<8x32xf32>
    %46 = arith.subf %45, %43 : vector<8x32xf32>
    %47 = arith.mulf %46, %35 : vector<8x32xf32>
    %48 = arith.addf %44, %47 : vector<8x32xf32>
    %c0_27 = arith.constant 0 : index
    %c0_28 = arith.constant 0 : index
    %c0_29 = arith.constant 0 : index
    %c32 = arith.constant 32 : index
    %49 = vector.load %arg9[%c0_27, %c0_28, %c0_29, %c32] : memref<1x1x8x512xf32, #tpu.memory_space<vmem>>, vector<1x1x8x32xf32>
    %50 = vector.shape_cast %49 : vector<1x1x8x32xf32> to vector<8x32xf32>
    %51 = vector.shape_cast %48 : vector<8x32xf32> to vector<1x1x8x32xf32>
    tpu.vector_store %arg9[%c0_27, %c0_28, %c0_29, %c32], %51 {strides = array<i32>} : memref<1x1x8x512xf32, #tpu.memory_space<vmem>>, vector<1x1x8x32xf32>,
    %52 = vector.extract_strided_slice %10 {offsets = [16, 0], sizes = [8, 32], strides = [1, 1]} : vector<128x32xf32> to vector<8x32xf32>
    %53 = vector.extract_strided_slice %15 {offsets = [16, 0], sizes = [8, 32], strides = [1, 1]} : vector<128x32xf32> to vector<8x32xf32>
    %cst_30 = arith.constant dense<0.000000e+00> : vector<8x32xf32>
    %54 = tpu.matmul %48, %16, %cst_30 {dimension_numbers = #tpu.dot_dimension_numbers<[1], [0], [0], [1], [0, 0, 1, 1], [], []>} : vector<8x32xf32>, vector<32x32xf32>, vector<8x32xf32> -> vector<8x32xf32>
    %55 = arith.addf %53, %54 : vector<8x32xf32>
    %56 = arith.negf %55 : vector<8x32xf32>
    %57 = math.exp %56 : vector<8x32xf32>
    %cst_31 = arith.constant 1.000000e+00 : f32
    %58 = vector.broadcast %cst_31 : f32 to vector<8x32xf32>
    %59 = arith.addf %58, %57 : vector<8x32xf32>
    %60 = arith.divf %58, %59 : vector<8x32xf32>
    %61 = arith.mulf %60, %48 : vector<8x32xf32>
    %cst_32 = arith.constant 1.000000e+00 : f32
    %62 = vector.broadcast %cst_32 : f32 to vector<8x32xf32>
    %63 = arith.subf %62, %60 : vector<8x32xf32>
    %64 = arith.mulf %63, %52 : vector<8x32xf32>
    %65 = arith.addf %61, %64 : vector<8x32xf32>
    %c0_33 = arith.constant 0 : index
    %c0_34 = arith.constant 0 : index
    %c0_35 = arith.constant 0 : index
    %c64 = arith.constant 64 : index
    %66 = vector.load %arg9[%c0_33, %c0_34, %c0_35, %c64] : memref<1x1x8x512xf32, #tpu.memory_space<vmem>>, vector<1x1x8x32xf32>
    %67 = vector.shape_cast %66 : vector<1x1x8x32xf32> to vector<8x32xf32>
    %68 = vector.shape_cast %65 : vector<8x32xf32> to vector<1x1x8x32xf32>
    tpu.vector_store %arg9[%c0_33, %c0_34, %c0_35, %c64], %68 {strides = array<i32>} : memref<1x1x8x512xf32, #tpu.memory_space<vmem>>, vector<1x1x8x32xf32>,
    %69 = vector.extract_strided_slice %10 {offsets = [24, 0], sizes = [8, 32], strides = [1, 1]} : vector<128x32xf32> to vector<8x32xf32>
    %70 = vector.extract_strided_slice %15 {offsets = [24, 0], sizes = [8, 32], strides = [1, 1]} : vector<128x32xf32> to vector<8x32xf32>
    %cst_36 = arith.constant dense<0.000000e+00> : vector<8x32xf32>
    %71 = tpu.matmul %65, %16, %cst_36 {dimension_numbers = #tpu.dot_dimension_numbers<[1], [0], [0], [1], [0, 0, 1, 1], [], []>} : vector<8x32xf32>, vector<32x32xf32>, vector<8x32xf32> -> vector<8x32xf32>
    %72 = arith.addf %70, %71 : vector<8x32xf32>
    %73 = arith.negf %72 : vector<8x32xf32>
    %74 = math.exp %73 : vector<8x32xf32>
    %cst_37 = arith.constant 1.000000e+00 : f32
    %75 = vector.broadcast %cst_37 : f32 to vector<8x32xf32>
    %76 = arith.addf %75, %74 : vector<8x32xf32>
    %77 = arith.divf %75, %76 : vector<8x32xf32>
    %78 = arith.mulf %77, %65 : vector<8x32xf32>
    %cst_38 = arith.constant 1.000000e+00 : f32
    %79 = vector.broadcast %cst_38 : f32 to vector<8x32xf32>
    %80 = arith.subf %79, %77 : vector<8x32xf32>
    %81 = arith.mulf %80, %69 : vector<8x32xf32>
    %82 = arith.addf %78, %81 : vector<8x32xf32>
    %c0_39 = arith.constant 0 : index
    %c0_40 = arith.constant 0 : index
    %c0_41 = arith.constant 0 : index
    %c96 = arith.constant 96 : index
    %83 = vector.load %arg9[%c0_39, %c0_40, %c0_41, %c96] : memref<1x1x8x512xf32, #tpu.memory_space<vmem>>, vector<1x1x8x32xf32>
    %84 = vector.shape_cast %83 : vector<1x1x8x32xf32> to vector<8x32xf32>
    %85 = vector.shape_cast %82 : vector<8x32xf32> to vector<1x1x8x32xf32>
    tpu.vector_store %arg9[%c0_39, %c0_40, %c0_41, %c96], %85 {strides = array<i32>} : memref<1x1x8x512xf32, #tpu.memory_space<vmem>>, vector<1x1x8x32xf32>,
    %86 = vector.extract_strided_slice %10 {offsets = [32, 0], sizes = [8, 32], strides = [1, 1]} : vector<128x32xf32> to vector<8x32xf32>
    %87 = vector.extract_strided_slice %15 {offsets = [32, 0], sizes = [8, 32], strides = [1, 1]} : vector<128x32xf32> to vector<8x32xf32>
    %cst_42 = arith.constant dense<0.000000e+00> : vector<8x32xf32>
    %88 = tpu.matmul %82, %16, %cst_42 {dimension_numbers = #tpu.dot_dimension_numbers<[1], [0], [0], [1], [0, 0, 1, 1], [], []>} : vector<8x32xf32>, vector<32x32xf32>, vector<8x32xf32> -> vector<8x32xf32>
    %89 = arith.addf %87, %88 : vector<8x32xf32>
    %90 = arith.negf %89 : vector<8x32xf32>
    %91 = math.exp %90 : vector<8x32xf32>
    %cst_43 = arith.constant 1.000000e+00 : f32
    %92 = vector.broadcast %cst_43 : f32 to vector<8x32xf32>
    %93 = arith.addf %92, %91 : vector<8x32xf32>
    %94 = arith.divf %92, %93 : vector<8x32xf32>
    %95 = arith.mulf %94, %82 : vector<8x32xf32>
    %cst_44 = arith.constant 1.000000e+00 : f32
    %96 = vector.broadcast %cst_44 : f32 to vector<8x32xf32>
    %97 = arith.subf %96, %94 : vector<8x32xf32>
    %98 = arith.mulf %97, %86 : vector<8x32xf32>
    %99 = arith.addf %95, %98 : vector<8x32xf32>
    %c0_45 = arith.constant 0 : index
    %c0_46 = arith.constant 0 : index
    %c0_47 = arith.constant 0 : index
    %c128 = arith.constant 128 : index
    %100 = vector.load %arg9[%c0_45, %c0_46, %c0_47, %c128] : memref<1x1x8x512xf32, #tpu.memory_space<vmem>>, vector<1x1x8x32xf32>
    %101 = vector.shape_cast %100 : vector<1x1x8x32xf32> to vector<8x32xf32>
    %102 = vector.shape_cast %99 : vector<8x32xf32> to vector<1x1x8x32xf32>
    tpu.vector_store %arg9[%c0_45, %c0_46, %c0_47, %c128], %102 {strides = array<i32>} : memref<1x1x8x512xf32, #tpu.memory_space<vmem>>, vector<1x1x8x32xf32>,
    %103 = vector.extract_strided_slice %10 {offsets = [40, 0], sizes = [8, 32], strides = [1, 1]} : vector<128x32xf32> to vector<8x32xf32>
    %104 = vector.extract_strided_slice %15 {offsets = [40, 0], sizes = [8, 32], strides = [1, 1]} : vector<128x32xf32> to vector<8x32xf32>
    %cst_48 = arith.constant dense<0.000000e+00> : vector<8x32xf32>
    %105 = tpu.matmul %99, %16, %cst_48 {dimension_numbers = #tpu.dot_dimension_numbers<[1], [0], [0], [1], [0, 0, 1, 1], [], []>} : vector<8x32xf32>, vector<32x32xf32>, vector<8x32xf32> -> vector<8x32xf32>
    %106 = arith.addf %104, %105 : vector<8x32xf32>
    %107 = arith.negf %106 : vector<8x32xf32>
    %108 = math.exp %107 : vector<8x32xf32>
    %cst_49 = arith.constant 1.000000e+00 : f32
    %109 = vector.broadcast %cst_49 : f32 to vector<8x32xf32>
    %110 = arith.addf %109, %108 : vector<8x32xf32>
    %111 = arith.divf %109, %110 : vector<8x32xf32>
    %112 = arith.mulf %111, %99 : vector<8x32xf32>
    %cst_50 = arith.constant 1.000000e+00 : f32
    %113 = vector.broadcast %cst_50 : f32 to vector<8x32xf32>
    %114 = arith.subf %113, %111 : vector<8x32xf32>
    %115 = arith.mulf %114, %103 : vector<8x32xf32>
    %116 = arith.addf %112, %115 : vector<8x32xf32>
    %c0_51 = arith.constant 0 : index
    %c0_52 = arith.constant 0 : index
    %c0_53 = arith.constant 0 : index
    %c160 = arith.constant 160 : index
    %117 = vector.load %arg9[%c0_51, %c0_52, %c0_53, %c160] : memref<1x1x8x512xf32, #tpu.memory_space<vmem>>, vector<1x1x8x32xf32>
    %118 = vector.shape_cast %117 : vector<1x1x8x32xf32> to vector<8x32xf32>
    %119 = vector.shape_cast %116 : vector<8x32xf32> to vector<1x1x8x32xf32>
    tpu.vector_store %arg9[%c0_51, %c0_52, %c0_53, %c160], %119 {strides = array<i32>} : memref<1x1x8x512xf32, #tpu.memory_space<vmem>>, vector<1x1x8x32xf32>,
    %120 = vector.extract_strided_slice %10 {offsets = [48, 0], sizes = [8, 32], strides = [1, 1]} : vector<128x32xf32> to vector<8x32xf32>
    %121 = vector.extract_strided_slice %15 {offsets = [48, 0], sizes = [8, 32], strides = [1, 1]} : vector<128x32xf32> to vector<8x32xf32>
    %cst_54 = arith.constant dense<0.000000e+00> : vector<8x32xf32>
    %122 = tpu.matmul %116, %16, %cst_54 {dimension_numbers = #tpu.dot_dimension_numbers<[1], [0], [0], [1], [0, 0, 1, 1], [], []>} : vector<8x32xf32>, vector<32x32xf32>, vector<8x32xf32> -> vector<8x32xf32>
    %123 = arith.addf %121, %122 : vector<8x32xf32>
    %124 = arith.negf %123 : vector<8x32xf32>
    %125 = math.exp %124 : vector<8x32xf32>
    %cst_55 = arith.constant 1.000000e+00 : f32
    %126 = vector.broadcast %cst_55 : f32 to vector<8x32xf32>
    %127 = arith.addf %126, %125 : vector<8x32xf32>
    %128 = arith.divf %126, %127 : vector<8x32xf32>
    %129 = arith.mulf %128, %116 : vector<8x32xf32>
    %cst_56 = arith.constant 1.000000e+00 : f32
    %130 = vector.broadcast %cst_56 : f32 to vector<8x32xf32>
    %131 = arith.subf %130, %128 : vector<8x32xf32>
    %132 = arith.mulf %131, %120 : vector<8x32xf32>
    %133 = arith.addf %129, %132 : vector<8x32xf32>
    %c0_57 = arith.constant 0 : index
    %c0_58 = arith.constant 0 : index
    %c0_59 = arith.constant 0 : index
    %c192 = arith.constant 192 : index
    %134 = vector.load %arg9[%c0_57, %c0_58, %c0_59, %c192] : memref<1x1x8x512xf32, #tpu.memory_space<vmem>>, vector<1x1x8x32xf32>
    %135 = vector.shape_cast %134 : vector<1x1x8x32xf32> to vector<8x32xf32>
    %136 = vector.shape_cast %133 : vector<8x32xf32> to vector<1x1x8x32xf32>
    tpu.vector_store %arg9[%c0_57, %c0_58, %c0_59, %c192], %136 {strides = array<i32>} : memref<1x1x8x512xf32, #tpu.memory_space<vmem>>, vector<1x1x8x32xf32>,
    %137 = vector.extract_strided_slice %10 {offsets = [56, 0], sizes = [8, 32], strides = [1, 1]} : vector<128x32xf32> to vector<8x32xf32>
    %138 = vector.extract_strided_slice %15 {offsets = [56, 0], sizes = [8, 32], strides = [1, 1]} : vector<128x32xf32> to vector<8x32xf32>
    %cst_60 = arith.constant dense<0.000000e+00> : vector<8x32xf32>
    %139 = tpu.matmul %133, %16, %cst_60 {dimension_numbers = #tpu.dot_dimension_numbers<[1], [0], [0], [1], [0, 0, 1, 1], [], []>} : vector<8x32xf32>, vector<32x32xf32>, vector<8x32xf32> -> vector<8x32xf32>
    %140 = arith.addf %138, %139 : vector<8x32xf32>
    %141 = arith.negf %140 : vector<8x32xf32>
    %142 = math.exp %141 : vector<8x32xf32>
    %cst_61 = arith.constant 1.000000e+00 : f32
    %143 = vector.broadcast %cst_61 : f32 to vector<8x32xf32>
    %144 = arith.addf %143, %142 : vector<8x32xf32>
    %145 = arith.divf %143, %144 : vector<8x32xf32>
    %146 = arith.mulf %145, %133 : vector<8x32xf32>
    %cst_62 = arith.constant 1.000000e+00 : f32
    %147 = vector.broadcast %cst_62 : f32 to vector<8x32xf32>
    %148 = arith.subf %147, %145 : vector<8x32xf32>
    %149 = arith.mulf %148, %137 : vector<8x32xf32>
    %150 = arith.addf %146, %149 : vector<8x32xf32>
    %c0_63 = arith.constant 0 : index
    %c0_64 = arith.constant 0 : index
    %c0_65 = arith.constant 0 : index
    %c224 = arith.constant 224 : index
    %151 = vector.load %arg9[%c0_63, %c0_64, %c0_65, %c224] : memref<1x1x8x512xf32, #tpu.memory_space<vmem>>, vector<1x1x8x32xf32>
    %152 = vector.shape_cast %151 : vector<1x1x8x32xf32> to vector<8x32xf32>
    %153 = vector.shape_cast %150 : vector<8x32xf32> to vector<1x1x8x32xf32>
    tpu.vector_store %arg9[%c0_63, %c0_64, %c0_65, %c224], %153 {strides = array<i32>} : memref<1x1x8x512xf32, #tpu.memory_space<vmem>>, vector<1x1x8x32xf32>,
    %154 = vector.extract_strided_slice %10 {offsets = [64, 0], sizes = [8, 32], strides = [1, 1]} : vector<128x32xf32> to vector<8x32xf32>
    %155 = vector.extract_strided_slice %15 {offsets = [64, 0], sizes = [8, 32], strides = [1, 1]} : vector<128x32xf32> to vector<8x32xf32>
    %cst_66 = arith.constant dense<0.000000e+00> : vector<8x32xf32>
    %156 = tpu.matmul %150, %16, %cst_66 {dimension_numbers = #tpu.dot_dimension_numbers<[1], [0], [0], [1], [0, 0, 1, 1], [], []>} : vector<8x32xf32>, vector<32x32xf32>, vector<8x32xf32> -> vector<8x32xf32>
    %157 = arith.addf %155, %156 : vector<8x32xf32>
    %158 = arith.negf %157 : vector<8x32xf32>
    %159 = math.exp %158 : vector<8x32xf32>
    %cst_67 = arith.constant 1.000000e+00 : f32
    %160 = vector.broadcast %cst_67 : f32 to vector<8x32xf32>
    %161 = arith.addf %160, %159 : vector<8x32xf32>
    %162 = arith.divf %160, %161 : vector<8x32xf32>
    %163 = arith.mulf %162, %150 : vector<8x32xf32>
    %cst_68 = arith.constant 1.000000e+00 : f32
    %164 = vector.broadcast %cst_68 : f32 to vector<8x32xf32>
    %165 = arith.subf %164, %162 : vector<8x32xf32>
    %166 = arith.mulf %165, %154 : vector<8x32xf32>
    %167 = arith.addf %163, %166 : vector<8x32xf32>
    %c0_69 = arith.constant 0 : index
    %c0_70 = arith.constant 0 : index
    %c0_71 = arith.constant 0 : index
    %c256 = arith.constant 256 : index
    %168 = vector.load %arg9[%c0_69, %c0_70, %c0_71, %c256] : memref<1x1x8x512xf32, #tpu.memory_space<vmem>>, vector<1x1x8x32xf32>
    %169 = vector.shape_cast %168 : vector<1x1x8x32xf32> to vector<8x32xf32>
    %170 = vector.shape_cast %167 : vector<8x32xf32> to vector<1x1x8x32xf32>
    tpu.vector_store %arg9[%c0_69, %c0_70, %c0_71, %c256], %170 {strides = array<i32>} : memref<1x1x8x512xf32, #tpu.memory_space<vmem>>, vector<1x1x8x32xf32>,
    %171 = vector.extract_strided_slice %10 {offsets = [72, 0], sizes = [8, 32], strides = [1, 1]} : vector<128x32xf32> to vector<8x32xf32>
    %172 = vector.extract_strided_slice %15 {offsets = [72, 0], sizes = [8, 32], strides = [1, 1]} : vector<128x32xf32> to vector<8x32xf32>
    %cst_72 = arith.constant dense<0.000000e+00> : vector<8x32xf32>
    %173 = tpu.matmul %167, %16, %cst_72 {dimension_numbers = #tpu.dot_dimension_numbers<[1], [0], [0], [1], [0, 0, 1, 1], [], []>} : vector<8x32xf32>, vector<32x32xf32>, vector<8x32xf32> -> vector<8x32xf32>
    %174 = arith.addf %172, %173 : vector<8x32xf32>
    %175 = arith.negf %174 : vector<8x32xf32>
    %176 = math.exp %175 : vector<8x32xf32>
    %cst_73 = arith.constant 1.000000e+00 : f32
    %177 = vector.broadcast %cst_73 : f32 to vector<8x32xf32>
    %178 = arith.addf %177, %176 : vector<8x32xf32>
    %179 = arith.divf %177, %178 : vector<8x32xf32>
    %180 = arith.mulf %179, %167 : vector<8x32xf32>
    %cst_74 = arith.constant 1.000000e+00 : f32
    %181 = vector.broadcast %cst_74 : f32 to vector<8x32xf32>
    %182 = arith.subf %181, %179 : vector<8x32xf32>
    %183 = arith.mulf %182, %171 : vector<8x32xf32>
    %184 = arith.addf %180, %183 : vector<8x32xf32>
    %c0_75 = arith.constant 0 : index
    %c0_76 = arith.constant 0 : index
    %c0_77 = arith.constant 0 : index
    %c288 = arith.constant 288 : index
    %185 = vector.load %arg9[%c0_75, %c0_76, %c0_77, %c288] : memref<1x1x8x512xf32, #tpu.memory_space<vmem>>, vector<1x1x8x32xf32>
    %186 = vector.shape_cast %185 : vector<1x1x8x32xf32> to vector<8x32xf32>
    %187 = vector.shape_cast %184 : vector<8x32xf32> to vector<1x1x8x32xf32>
    tpu.vector_store %arg9[%c0_75, %c0_76, %c0_77, %c288], %187 {strides = array<i32>} : memref<1x1x8x512xf32, #tpu.memory_space<vmem>>, vector<1x1x8x32xf32>,
    %188 = vector.extract_strided_slice %10 {offsets = [80, 0], sizes = [8, 32], strides = [1, 1]} : vector<128x32xf32> to vector<8x32xf32>
    %189 = vector.extract_strided_slice %15 {offsets = [80, 0], sizes = [8, 32], strides = [1, 1]} : vector<128x32xf32> to vector<8x32xf32>
    %cst_78 = arith.constant dense<0.000000e+00> : vector<8x32xf32>
    %190 = tpu.matmul %184, %16, %cst_78 {dimension_numbers = #tpu.dot_dimension_numbers<[1], [0], [0], [1], [0, 0, 1, 1], [], []>} : vector<8x32xf32>, vector<32x32xf32>, vector<8x32xf32> -> vector<8x32xf32>
    %191 = arith.addf %189, %190 : vector<8x32xf32>
    %192 = arith.negf %191 : vector<8x32xf32>
    %193 = math.exp %192 : vector<8x32xf32>
    %cst_79 = arith.constant 1.000000e+00 : f32
    %194 = vector.broadcast %cst_79 : f32 to vector<8x32xf32>
    %195 = arith.addf %194, %193 : vector<8x32xf32>
    %196 = arith.divf %194, %195 : vector<8x32xf32>
    %197 = arith.mulf %196, %184 : vector<8x32xf32>
    %cst_80 = arith.constant 1.000000e+00 : f32
    %198 = vector.broadcast %cst_80 : f32 to vector<8x32xf32>
    %199 = arith.subf %198, %196 : vector<8x32xf32>
    %200 = arith.mulf %199, %188 : vector<8x32xf32>
    %201 = arith.addf %197, %200 : vector<8x32xf32>
    %c0_81 = arith.constant 0 : index
    %c0_82 = arith.constant 0 : index
    %c0_83 = arith.constant 0 : index
    %c320 = arith.constant 320 : index
    %202 = vector.load %arg9[%c0_81, %c0_82, %c0_83, %c320] : memref<1x1x8x512xf32, #tpu.memory_space<vmem>>, vector<1x1x8x32xf32>
    %203 = vector.shape_cast %202 : vector<1x1x8x32xf32> to vector<8x32xf32>
    %204 = vector.shape_cast %201 : vector<8x32xf32> to vector<1x1x8x32xf32>
    tpu.vector_store %arg9[%c0_81, %c0_82, %c0_83, %c320], %204 {strides = array<i32>} : memref<1x1x8x512xf32, #tpu.memory_space<vmem>>, vector<1x1x8x32xf32>,
    %205 = vector.extract_strided_slice %10 {offsets = [88, 0], sizes = [8, 32], strides = [1, 1]} : vector<128x32xf32> to vector<8x32xf32>
    %206 = vector.extract_strided_slice %15 {offsets = [88, 0], sizes = [8, 32], strides = [1, 1]} : vector<128x32xf32> to vector<8x32xf32>
    %cst_84 = arith.constant dense<0.000000e+00> : vector<8x32xf32>
    %207 = tpu.matmul %201, %16, %cst_84 {dimension_numbers = #tpu.dot_dimension_numbers<[1], [0], [0], [1], [0, 0, 1, 1], [], []>} : vector<8x32xf32>, vector<32x32xf32>, vector<8x32xf32> -> vector<8x32xf32>
    %208 = arith.addf %206, %207 : vector<8x32xf32>
    %209 = arith.negf %208 : vector<8x32xf32>
    %210 = math.exp %209 : vector<8x32xf32>
    %cst_85 = arith.constant 1.000000e+00 : f32
    %211 = vector.broadcast %cst_85 : f32 to vector<8x32xf32>
    %212 = arith.addf %211, %210 : vector<8x32xf32>
    %213 = arith.divf %211, %212 : vector<8x32xf32>
    %214 = arith.mulf %213, %201 : vector<8x32xf32>
    %cst_86 = arith.constant 1.000000e+00 : f32
    %215 = vector.broadcast %cst_86 : f32 to vector<8x32xf32>
    %216 = arith.subf %215, %213 : vector<8x32xf32>
    %217 = arith.mulf %216, %205 : vector<8x32xf32>
    %218 = arith.addf %214, %217 : vector<8x32xf32>
    %c0_87 = arith.constant 0 : index
    %c0_88 = arith.constant 0 : index
    %c0_89 = arith.constant 0 : index
    %c352 = arith.constant 352 : index
    %219 = vector.load %arg9[%c0_87, %c0_88, %c0_89, %c352] : memref<1x1x8x512xf32, #tpu.memory_space<vmem>>, vector<1x1x8x32xf32>
    %220 = vector.shape_cast %219 : vector<1x1x8x32xf32> to vector<8x32xf32>
    %221 = vector.shape_cast %218 : vector<8x32xf32> to vector<1x1x8x32xf32>
    tpu.vector_store %arg9[%c0_87, %c0_88, %c0_89, %c352], %221 {strides = array<i32>} : memref<1x1x8x512xf32, #tpu.memory_space<vmem>>, vector<1x1x8x32xf32>,
    %222 = vector.extract_strided_slice %10 {offsets = [96, 0], sizes = [8, 32], strides = [1, 1]} : vector<128x32xf32> to vector<8x32xf32>
    %223 = vector.extract_strided_slice %15 {offsets = [96, 0], sizes = [8, 32], strides = [1, 1]} : vector<128x32xf32> to vector<8x32xf32>
    %cst_90 = arith.constant dense<0.000000e+00> : vector<8x32xf32>
    %224 = tpu.matmul %218, %16, %cst_90 {dimension_numbers = #tpu.dot_dimension_numbers<[1], [0], [0], [1], [0, 0, 1, 1], [], []>} : vector<8x32xf32>, vector<32x32xf32>, vector<8x32xf32> -> vector<8x32xf32>
    %225 = arith.addf %223, %224 : vector<8x32xf32>
    %226 = arith.negf %225 : vector<8x32xf32>
    %227 = math.exp %226 : vector<8x32xf32>
    %cst_91 = arith.constant 1.000000e+00 : f32
    %228 = vector.broadcast %cst_91 : f32 to vector<8x32xf32>
    %229 = arith.addf %228, %227 : vector<8x32xf32>
    %230 = arith.divf %228, %229 : vector<8x32xf32>
    %231 = arith.mulf %230, %218 : vector<8x32xf32>
    %cst_92 = arith.constant 1.000000e+00 : f32
    %232 = vector.broadcast %cst_92 : f32 to vector<8x32xf32>
    %233 = arith.subf %232, %230 : vector<8x32xf32>
    %234 = arith.mulf %233, %222 : vector<8x32xf32>
    %235 = arith.addf %231, %234 : vector<8x32xf32>
    %c0_93 = arith.constant 0 : index
    %c0_94 = arith.constant 0 : index
    %c0_95 = arith.constant 0 : index
    %c384 = arith.constant 384 : index
    %236 = vector.load %arg9[%c0_93, %c0_94, %c0_95, %c384] : memref<1x1x8x512xf32, #tpu.memory_space<vmem>>, vector<1x1x8x32xf32>
    %237 = vector.shape_cast %236 : vector<1x1x8x32xf32> to vector<8x32xf32>
    %238 = vector.shape_cast %235 : vector<8x32xf32> to vector<1x1x8x32xf32>
    tpu.vector_store %arg9[%c0_93, %c0_94, %c0_95, %c384], %238 {strides = array<i32>} : memref<1x1x8x512xf32, #tpu.memory_space<vmem>>, vector<1x1x8x32xf32>,
    %239 = vector.extract_strided_slice %10 {offsets = [104, 0], sizes = [8, 32], strides = [1, 1]} : vector<128x32xf32> to vector<8x32xf32>
    %240 = vector.extract_strided_slice %15 {offsets = [104, 0], sizes = [8, 32], strides = [1, 1]} : vector<128x32xf32> to vector<8x32xf32>
    %cst_96 = arith.constant dense<0.000000e+00> : vector<8x32xf32>
    %241 = tpu.matmul %235, %16, %cst_96 {dimension_numbers = #tpu.dot_dimension_numbers<[1], [0], [0], [1], [0, 0, 1, 1], [], []>} : vector<8x32xf32>, vector<32x32xf32>, vector<8x32xf32> -> vector<8x32xf32>
    %242 = arith.addf %240, %241 : vector<8x32xf32>
    %243 = arith.negf %242 : vector<8x32xf32>
    %244 = math.exp %243 : vector<8x32xf32>
    %cst_97 = arith.constant 1.000000e+00 : f32
    %245 = vector.broadcast %cst_97 : f32 to vector<8x32xf32>
    %246 = arith.addf %245, %244 : vector<8x32xf32>
    %247 = arith.divf %245, %246 : vector<8x32xf32>
    %248 = arith.mulf %247, %235 : vector<8x32xf32>
    %cst_98 = arith.constant 1.000000e+00 : f32
    %249 = vector.broadcast %cst_98 : f32 to vector<8x32xf32>
    %250 = arith.subf %249, %247 : vector<8x32xf32>
    %251 = arith.mulf %250, %239 : vector<8x32xf32>
    %252 = arith.addf %248, %251 : vector<8x32xf32>
    %c0_99 = arith.constant 0 : index
    %c0_100 = arith.constant 0 : index
    %c0_101 = arith.constant 0 : index
    %c416 = arith.constant 416 : index
    %253 = vector.load %arg9[%c0_99, %c0_100, %c0_101, %c416] : memref<1x1x8x512xf32, #tpu.memory_space<vmem>>, vector<1x1x8x32xf32>
    %254 = vector.shape_cast %253 : vector<1x1x8x32xf32> to vector<8x32xf32>
    %255 = vector.shape_cast %252 : vector<8x32xf32> to vector<1x1x8x32xf32>
    tpu.vector_store %arg9[%c0_99, %c0_100, %c0_101, %c416], %255 {strides = array<i32>} : memref<1x1x8x512xf32, #tpu.memory_space<vmem>>, vector<1x1x8x32xf32>,
    %256 = vector.extract_strided_slice %10 {offsets = [112, 0], sizes = [8, 32], strides = [1, 1]} : vector<128x32xf32> to vector<8x32xf32>
    %257 = vector.extract_strided_slice %15 {offsets = [112, 0], sizes = [8, 32], strides = [1, 1]} : vector<128x32xf32> to vector<8x32xf32>
    %cst_102 = arith.constant dense<0.000000e+00> : vector<8x32xf32>
    %258 = tpu.matmul %252, %16, %cst_102 {dimension_numbers = #tpu.dot_dimension_numbers<[1], [0], [0], [1], [0, 0, 1, 1], [], []>} : vector<8x32xf32>, vector<32x32xf32>, vector<8x32xf32> -> vector<8x32xf32>
    %259 = arith.addf %257, %258 : vector<8x32xf32>
    %260 = arith.negf %259 : vector<8x32xf32>
    %261 = math.exp %260 : vector<8x32xf32>
    %cst_103 = arith.constant 1.000000e+00 : f32
    %262 = vector.broadcast %cst_103 : f32 to vector<8x32xf32>
    %263 = arith.addf %262, %261 : vector<8x32xf32>
    %264 = arith.divf %262, %263 : vector<8x32xf32>
    %265 = arith.mulf %264, %252 : vector<8x32xf32>
    %cst_104 = arith.constant 1.000000e+00 : f32
    %266 = vector.broadcast %cst_104 : f32 to vector<8x32xf32>
    %267 = arith.subf %266, %264 : vector<8x32xf32>
    %268 = arith.mulf %267, %256 : vector<8x32xf32>
    %269 = arith.addf %265, %268 : vector<8x32xf32>
    %c0_105 = arith.constant 0 : index
    %c0_106 = arith.constant 0 : index
    %c0_107 = arith.constant 0 : index
    %c448 = arith.constant 448 : index
    %270 = vector.load %arg9[%c0_105, %c0_106, %c0_107, %c448] : memref<1x1x8x512xf32, #tpu.memory_space<vmem>>, vector<1x1x8x32xf32>
    %271 = vector.shape_cast %270 : vector<1x1x8x32xf32> to vector<8x32xf32>
    %272 = vector.shape_cast %269 : vector<8x32xf32> to vector<1x1x8x32xf32>
    tpu.vector_store %arg9[%c0_105, %c0_106, %c0_107, %c448], %272 {strides = array<i32>} : memref<1x1x8x512xf32, #tpu.memory_space<vmem>>, vector<1x1x8x32xf32>,
    %273 = vector.extract_strided_slice %10 {offsets = [120, 0], sizes = [8, 32], strides = [1, 1]} : vector<128x32xf32> to vector<8x32xf32>
    %274 = vector.extract_strided_slice %15 {offsets = [120, 0], sizes = [8, 32], strides = [1, 1]} : vector<128x32xf32> to vector<8x32xf32>
    %cst_108 = arith.constant dense<0.000000e+00> : vector<8x32xf32>
    %275 = tpu.matmul %269, %16, %cst_108 {dimension_numbers = #tpu.dot_dimension_numbers<[1], [0], [0], [1], [0, 0, 1, 1], [], []>} : vector<8x32xf32>, vector<32x32xf32>, vector<8x32xf32> -> vector<8x32xf32>
    %276 = arith.addf %274, %275 : vector<8x32xf32>
    %277 = arith.negf %276 : vector<8x32xf32>
    %278 = math.exp %277 : vector<8x32xf32>
    %cst_109 = arith.constant 1.000000e+00 : f32
    %279 = vector.broadcast %cst_109 : f32 to vector<8x32xf32>
    %280 = arith.addf %279, %278 : vector<8x32xf32>
    %281 = arith.divf %279, %280 : vector<8x32xf32>
    %282 = arith.mulf %281, %269 : vector<8x32xf32>
    %cst_110 = arith.constant 1.000000e+00 : f32
    %283 = vector.broadcast %cst_110 : f32 to vector<8x32xf32>
    %284 = arith.subf %283, %281 : vector<8x32xf32>
    %285 = arith.mulf %284, %273 : vector<8x32xf32>
    %286 = arith.addf %282, %285 : vector<8x32xf32>
    %c0_111 = arith.constant 0 : index
    %c0_112 = arith.constant 0 : index
    %c0_113 = arith.constant 0 : index
    %c480 = arith.constant 480 : index
    %287 = vector.load %arg9[%c0_111, %c0_112, %c0_113, %c480] : memref<1x1x8x512xf32, #tpu.memory_space<vmem>>, vector<1x1x8x32xf32>
    %288 = vector.shape_cast %287 : vector<1x1x8x32xf32> to vector<8x32xf32>
    %289 = vector.shape_cast %286 : vector<8x32xf32> to vector<1x1x8x32xf32>
    tpu.vector_store %arg9[%c0_111, %c0_112, %c0_113, %c480], %289 {strides = array<i32>} : memref<1x1x8x512xf32, #tpu.memory_space<vmem>>, vector<1x1x8x32xf32>,
    %c0_114 = arith.constant 0 : index
    %c0_115 = arith.constant 0 : index
    %290 = vector.load %arg10[%c0_114, %c0_115] : memref<8x32xf32, #tpu.memory_space<vmem>>, vector<8x32xf32>
    tpu.vector_store %arg10[%c0_114, %c0_115], %286 {strides = array<i32>} : memref<8x32xf32, #tpu.memory_space<vmem>>, vector<8x32xf32>,
    return
  }
  func.func @transform_0(%arg0: i32, %arg1: i32) -> (i32, i32, i32, i32) {
    %c0_i32 = arith.constant 0 : i32
    %c0_i32_0 = arith.constant 0 : i32
    %c0_i32_1 = arith.constant 0 : i32
    return %arg0, %arg1, %c0_i32, %c0_i32_0 : i32, i32, i32, i32
  }
  func.func @transform_1(%arg0: i32, %arg1: i32) -> (i32, i32, i32) {
    %c0_i32 = arith.constant 0 : i32
    %c0_i32_0 = arith.constant 0 : i32
    %c0_i32_1 = arith.constant 0 : i32
    return %arg0, %c0_i32, %c0_i32_0 : i32, i32, i32
  }
  func.func @transform_2(%arg0: i32, %arg1: i32) -> (i32, i32) {
    %c0_i32 = arith.constant 0 : i32
    %c0_i32_0 = arith.constant 0 : i32
    %c0_i32_1 = arith.constant 0 : i32
    return %c0_i32, %c0_i32_0 : i32, i32
  }
  func.func @transform_3(%arg0: i32, %arg1: i32) -> (i32, i32) {
    %c0_i32 = arith.constant 0 : i32
    %c0_i32_0 = arith.constant 0 : i32
    %c0_i32_1 = arith.constant 0 : i32
    return %c0_i32, %c0_i32_0 : i32, i32
  }
  func.func @transform_4(%arg0: i32, %arg1: i32) -> (i32, i32) {
    %c0_i32 = arith.constant 0 : i32
    %c0_i32_0 = arith.constant 0 : i32
    %c0_i32_1 = arith.constant 0 : i32
    return %c0_i32, %c0_i32_0 : i32, i32
  }
  func.func @transform_5(%arg0: i32, %arg1: i32) -> (i32, i32) {
    %c0_i32 = arith.constant 0 : i32
    %c0_i32_0 = arith.constant 0 : i32
    %c0_i32_1 = arith.constant 0 : i32
    return %c0_i32, %c0_i32_0 : i32, i32
  }
  func.func @transform_6(%arg0: i32, %arg1: i32) -> (i32, i32) {
    %c0_i32 = arith.constant 0 : i32
    %c0_i32_0 = arith.constant 0 : i32
    %c0_i32_1 = arith.constant 0 : i32
    return %c0_i32, %c0_i32_0 : i32, i32
  }
  func.func @transform_7(%arg0: i32, %arg1: i32) -> (i32, i32, i32, i32) {
    %c0_i32 = arith.constant 0 : i32
    %c0_i32_0 = arith.constant 0 : i32
    %c0_i32_1 = arith.constant 0 : i32
    return %arg0, %arg1, %c0_i32, %c0_i32_0 : i32, i32, i32, i32
  }
}

</mosaic_0001>

<bundles_post_ra>
// kernel: tpu_custom_call.1
= control target key start
LH: loop header
LB: loop body
LE: loop exit
PB: predicated region body
PF: predicated region fallthrough
CT: control target
= control target key end

     0   :  { %12 = vsyncpa [#allocation4], 0  ;;  %s2345_s0 = inlined_call_operand.vmem [shape: f32[2,1,128,16], index: 0, kind: input, shape index: {}]   ;;  %s2346_s1 = inlined_call_operand.vmem [shape: f32[2,8,32], index: 1, kind: input, shape index: {}]   ;;  %s2347_s2 = inlined_call_operand.vmem [shape: f32[16,32], index: 2, kind: input, shape index: {}]   ;;  %s2348_s3 = inlined_call_operand.vmem [shape: f32[1,32], index: 3, kind: input, shape index: {}]   ;;  %s2349_s4 = inlined_call_operand.vmem [shape: f32[32,32], index: 4, kind: input, shape index: {}]   ;;  %s2350_s5 = inlined_call_operand.vmem [shape: f32[32,32], index: 5, kind: input, shape index: {}]   ;;  %s2351_s6 = inlined_call_operand.vmem [shape: f32[1,32], index: 6, kind: input, shape index: {}]   ;;  %s2352_s7 = inlined_call_operand.hbm [shape: f32[2,1,8,512], index: 7, kind: output, shape index: {}]  }
   0x1   :  { %14 = vsyncpa [#allocation4 + $0x1], 0  ;;  %s1892_s24 = smov 0   ;;  %s1894_s25 = smov 0  }
   0x2   :  { %s1896_s26 = smov 0   ;;  %s1898_s27 = smov 0  }
   0x3   :  { %s1900_s28 = smov 0   ;;  %s1902_s29 = smov 0  }
   0x4 LB: > { %s1527_s30 = sadd.s32 4294967295, %s1847_s29   ;;  %s1528_s8 = sadd.s32 4294967294, %s1847_s29   ;;  %s1847_s29 = sphi %s1902_s29, %s20_s29   ;;  %s1843_s28 = sphi %s1900_s28, %s2359_s28   ;;  %s1839_s27 = sphi %s1898_s27, %s2358_s27   ;;  %s1835_s26 = sphi %s1896_s26, %s2357_s26   ;;  %s1831_s25 = sphi %s1894_s25, %s2356_s25   ;;  %s1827_s24 = sphi %s1892_s24, %s2355_s24  }
   0x5   : > { %s32_s9 = sadd.s32 1, %s1843_s28  ;;  %s200_s10 = sadd.s32 1, %s1835_s26 }
   0x6   : > { %p34_p0 = scmp.ge.s32.totalorder %s32_s9, 2  ;;  %p210_p1 = scmp.ne.s32.totalorder %s1835_s26, %s1831_s25 }
   0x7   : > { %p211_p2 = scmp.eq.s32.totalorder %s1527_s30, 1  ;;  %p216_p3 = scmp.ne.s32.totalorder %s1831_s25, %s1827_s24 }
   0x8   : > { %s2361_s9 = smov (%p34_p0, %s32_s9), 0  ;;  %p217_p5 = scmp.eq.s32.totalorder %s1528_s8, 1 }
   0x9   : > { %p1932_p4 = por %p211_p2, %p210_p1  ;;  %s195_s12 = ssub.s32 %s1843_s28, %s2361_s9 }
   0xa   : > { %p1531_p6 = scmp.ge.s32.totalorder %s1847_s29, 1  ;;  %p198_p7 = scmp.eq.s32.totalorder %s195_s12, 0 }
   0xb   : > { %p1939_p8 = por %p217_p5, %p216_p3  ;;  %p269_p9 = scmp.lt.s32.totalorder %s1847_s29, 3 }
   0xc   : > { %s1945_s14 = scalar_select %p198_p7, %s1835_s26, %s200_s10  }
   0xd   : > { %p270_p10 = pnand %p1531_p6, %p269_p9 }
   0xe   : > { %p309_p11 = scmp.lt.s32.totalorder (!%p270_p10), %s1839_s27, 1  ;;  %s1849_s10 = smov (!%p270_p10), 32  }
   0xf   : > { %273 = sbr.rel (%p270_p10) target bundleno = 3070 (0xbfe), region = 48  ;;  %s1850_s12 = smov (!%p270_p10), 64  }
  0x10   : > { %s1606_s16 = sshll.u32 (!%p270_p10), %s1839_s27, 5 }
  0x14   : > { %v346_v0 = vld [vmem:[%s2347_s2 + $0x8] sm:$0xff]  ;;  %v345_v1 = vld [vmem:[%s2347_s2] sm:$0xff]  ;;  %s1955_s19 = scalar_select %p309_p11, %s1839_s27, 1  ;;  %vm351_vm0 = vcmask 130048   ;;  %v484_v18 = vld [vmem:[%s2350_s5 + $0x18] sm:$0xff]  ;;  %vm327_vm1 = vcmask 261120  }
  0x15   : > { %414 = vmatpush.msra.mxu0 %v346_v0  ;;  %1607 = vmatpush.msra.mxu3 %v346_v0  ;;  %v483_v19 = vld [vmem:[%s2350_s5 + $0x10] sm:$0xff]  ;;  %v482_v20 = vld [vmem:[%s2350_s5 + $0x8] sm:$0xff]  ;;  %v481_v21 = vld [vmem:[%s2350_s5] sm:$0xff]  ;;  %vm707_vm10 = vcmask 523520   ;;  %vm759_vm15 = vcmask 785920  }
  0x16   : > { %s1605_s20 = sshll.u32 %s1955_s19, 7  ;;  %550 = vmatpush.msra.mxu1 %v484_v18  ;;  %1609 = vmatpush.msra.mxu2 %v484_v18  ;;  %v2010_v22 = vld [vmem:[%s2348_s3] ss:$0 sm:$0xff]  ;;  %v2061_v52 = vld [vmem:[%s2349_s4 + $0x18] sm:$0xff]  ;;  %v2073_v56 = vld [vmem:[%s2349_s4 + $0x10] sm:$0xff]  ;;  %s1535_s15 = sshll.u32 %s1955_s19, 3 }
  0x17   : > { %415 = vmatpush.msra.mxu0 %v345_v1  ;;  %1608 = vmatpush.msra.mxu3 %v345_v1  ;;  %s1961_s23 = scalar_lea.vmem %s2345_s0, %s1605_s20  ;;  %v2085_v60 = vld [vmem:[%s2349_s4 + $0x8] sm:$0xff]  ;;  %s321_s18 = scalar_lea.vmem %s2346_s1, %s1535_s15 }
  0x18   : > { %v329_v2 = vld [vmem:[%s1961_s23] sm:$0xff]  ;;  %v330_v3 = vld [vmem:[%s1961_s23 + $0x8] sm:$0xff]  ;;  %v331_v4 = vld [vmem:[%s1961_s23 + $0x10] sm:$0xff]  ;;  %551 = vmatpush.msra.mxu1 %v483_v19  ;;  %1610 = vmatpush.msra.mxu2 %v483_v19  ;;  %s1851_s15 = smov 96   ;;  %s1431_s20 = scalar_lea.hbm %s2352_s7, %s1606_s16 }
  0x19   : > { %1536 = vmatmul.msk.f32.vlgmr.msra.gmra.mxu0 %vm351_vm0, %v329_v2  ;;  %v332_v5 = vld [vmem:[%s1961_s23 + $0x18] sm:$0xff]  ;;  %v333_v6 = vld [vmem:[%s1961_s23 + $0x20] sm:$0xff]  ;;  %v334_v7 = vld [vmem:[%s1961_s23 + $0x28] sm:$0xff]  ;;  %671 = vmatpush.msrb.mxu3 %v2061_v52  ;;  %s1435_s19 = sshll.u32 %s1431_s20, 4  ;;  %s1436_s19 = int_to_ptr.hbm [resolvable:$true] %s1435_s19 }
  0x1a   : > { %v335_v8 = vld [vmem:[%s1961_s23 + $0x30] sm:$0xff]  ;;  %v336_v9 = vld [vmem:[%s1961_s23 + $0x38] sm:$0xff]  ;;  %v337_v10 = vld [vmem:[%s1961_s23 + $0x40] sm:$0xff]  ;;  %552 = vmatpush.msra.mxu1 %v482_v20  ;;  %1611 = vmatpush.msra.mxu2 %v482_v20 }
  0x1b   : > { %v342_v11 = vld [vmem:[%s1961_s23 + $0x68] sm:$0xff]  ;;  %v343_v13 = vld [vmem:[%s1961_s23 + $0x70] sm:$0xff]  ;;  %v344_v15 = vld [vmem:[%s1961_s23 + $0x78] sm:$0xff]  ;;  %672 = vmatpush.msrb.mxu3 %v2073_v56 }
  0x1c   : > { %1549 = vmatmul.msk.f32.vlgmr.msra.gmra.mxu3 %vm351_vm0, %v342_v11  ;;  %v338_v12 = vld [vmem:[%s1961_s23 + $0x48] sm:$0xff]  ;;  %v339_v14 = vld [vmem:[%s1961_s23 + $0x50] sm:$0xff]  ;;  %v340_v16 = vld [vmem:[%s1961_s23 + $0x58] sm:$0xff]  ;;  %553 = vmatpush.msra.mxu1 %v481_v21 }
  0x1d   : > { %v341_v17 = vld [vmem:[%s1961_s23 + $0x60] sm:$0xff]  ;;  %1612 = vmatpush.msra.mxu2 %v481_v21  ;;  %673 = vmatpush.msrb.mxu3 %v2085_v60  ;;  %s306_s23 = sand.u32 1, %s1831_s25  }
  0x1e   : > { %v326_v1 = vld [vmem:[%s321_s18] sm:$0xff]  ;;  %s1532_s30 = sshll.u32 %s306_s23, 5  ;;  %s1418_s22 = scalar_lea.sflag [#allocation4], %s306_s23 }
  0x1f   : > { %623 = vmatpush.msrb.mxu2 %v2061_v52  ;;  %v2101_v2 = vld [vmem:[%s2349_s4] sm:$0xff]  ;;  %328 = vst.msk [vmem:[#allocation2] sm:$0xff] %vm327_vm1, %v326_v1  ;;  %s2157_s8 = scalar_lea.vmem [#allocation3], %s1532_s30  ;;  %s1783_s30 = sshra.s32 %s1436_s19, 4  ;;  %s1784_s30 = int_to_ptr.hbm [resolvable:$true] %s1783_s30 }
  0x20   : > { %674 = vmatpush.msrb.mxu3 %v2101_v2  ;;  %s1433_s21 = sshll.u32 %s2157_s8, 4  ;;  %p1790_p1 = scmp.lt.s32.totalorder %s1784_s30, %s2352_s7  ;;  %s1434_s21 = int_to_ptr.vmem [resolvable:$true] %s1433_s21 }
  0x21   : > { %1537 = vmatmul.msk.f32.gmra.mxu0 %vm351_vm0, %v330_v3  ;;  %624 = vmatpush.msrb.mxu2 %v2073_v56 }
  0x22   : > { %775 = vmatpush.msra.mxu3 %v2061_v52 }
  0x23   : > { %625 = vmatpush.msrb.mxu2 %v2085_v60 }
  0x24   : > { %1550 = vmatmul.msk.f32.gmra.mxu3 %vm351_vm0, %v343_v13 }
  0x25   : > { %626 = vmatpush.msrb.mxu2 %v2101_v2  ;;  %776 = vmatpush.msra.mxu3 %v2073_v56 }
  0x27   : > { %777 = vmatpush.msra.mxu3 %v2085_v60 }
  0x29   : > { %1538 = vmatmul.msk.f32.gmra.mxu0 %vm351_vm0, %v331_v4  ;;  %778 = vmatpush.msra.mxu3 %v2101_v2 }
  0x2c   : > { %1551 = vmatmul.msk.f32.gmra.mxu3 %vm351_vm0, %v344_v15 }
  0x31   : > { %1539 = vmatmul.msk.f32.gmra.mxu0 %vm351_vm0, %v332_v5 }
  0x39   : > { %1540 = vmatmul.msk.f32.gmra.mxu0 %vm351_vm0, %v333_v6 }
  0x41   : > { %1541 = vmatmul.msk.f32.gmra.mxu0 %vm351_vm0, %v334_v7 }
  0x49   : > { %1542 = vmatmul.msk.f32.gmra.mxu0 %vm351_vm0, %v335_v8 }
  0x51   : > { %1543 = vmatmul.msk.f32.gmra.mxu0 %vm351_vm0, %v336_v9 }
  0x59   : > { %1544 = vmatmul.msk.f32.gmra.mxu0 %vm351_vm0, %v337_v10 }
  0x61   : > { %1545 = vmatmul.msk.f32.gmra.mxu0 %vm351_vm0, %v338_v12  ;;  %v607_v12 = vld [vmem:[#allocation2] sm:$0xff] }
  0x69   : > { %1546 = vmatmul.msk.f32.gmra.mxu0 %vm351_vm0, %v339_v14 }
  0x71   : > { %1547 = vmatmul.msk.f32.gmra.mxu0 %vm351_vm0, %v340_v16 }
  0x79   : > { %1548 = vmatmul.msk.f32.gmra.mxu0 %vm351_vm0, %v341_v17  ;;  %v2149_v17 = vld [vmem:[%s2351_s6] ss:$0 sm:$0xff] }
  0x96   : > { %v417_v23 = vpop.f32.mrf.mxu0 }
  0x97   : > { %v418_v24 = vadd.f32 %v2010_v22, %v417_v23 }
  0x99   : > { %1673 = vtanh.f32 %v418_v24 }
  0x9e   : > { %v420_v25 = vpop.f32.mrf.mxu0 }
  0x9f   : > { %v2013_v26 = vpop.eup %1673  ;;  %v421_v27 = vadd.f32 %v2010_v22, %v420_v25  ;;  %v456_v61 = vpop.f32.mrf.mxu3 }
  0xa0   : > { %1552 = vmatmul.msk.f32.vlgmr.msra.gmra.mxu1 %vm327_vm1, %v2013_v26  ;;  %v457_v3 = vadd.f32 %v2010_v22, %v456_v61 }
  0xa1   : > { %1675 = vtanh.f32 %v421_v27 }
  0xa6   : > { %v423_v28 = vpop.f32.mrf.mxu0 }
  0xa7   : > { %v2018_v29 = vpop.eup %1675  ;;  %v424_v30 = vadd.f32 %v2010_v22, %v423_v28  ;;  %v459_v4 = vpop.f32.mrf.mxu3 }
  0xa8   : > { %1553 = vmatmul.msk.f32.gmra.mxu1 %vm327_vm1, %v2018_v29  ;;  %v460_v6 = vadd.f32 %v2010_v22, %v459_v4 }
  0xa9   : > { %1677 = vtanh.f32 %v424_v30 }
  0xae   : > { %v426_v31 = vpop.f32.mrf.mxu0 }
  0xaf   : > { %v2023_v32 = vpop.eup %1677  ;;  %v427_v33 = vadd.f32 %v2010_v22, %v426_v31  ;;  %v462_v8 = vpop.f32.mrf.mxu3 }
  0xb0   : > { %1554 = vmatmul.msk.f32.gmra.mxu1 %vm327_vm1, %v2023_v32  ;;  %v463_v9 = vadd.f32 %v2010_v22, %v462_v8 }
  0xb1   : > { %1679 = vtanh.f32 %v427_v33 }
  0xb6   : > { %v429_v34 = vpop.f32.mrf.mxu0 }
  0xb7   : > { %v2028_v35 = vpop.eup %1679  ;;  %v430_v36 = vadd.f32 %v2010_v22, %v429_v34 }
  0xb8   : > { %1555 = vmatmul.msk.f32.gmra.mxu1 %vm327_vm1, %v2028_v35 }
  0xb9   : > { %1681 = vtanh.f32 %v430_v36 }
  0xbe   : > { %v432_v37 = vpop.f32.mrf.mxu0 }
  0xbf   : > { %v2033_v38 = vpop.eup %1681  ;;  %v433_v39 = vadd.f32 %v2010_v22, %v432_v37 }
  0xc0   : > { %1556 = vmatmul.msk.f32.gmra.mxu1 %vm327_vm1, %v2033_v38 }
  0xc1   : > { %1683 = vtanh.f32 %v433_v39 }
  0xc6   : > { %v435_v40 = vpop.f32.mrf.mxu0 }
  0xc7   : > { %v2038_v41 = vpop.eup %1683  ;;  %v436_v42 = vadd.f32 %v2010_v22, %v435_v40 }
  0xc8   : > { %1557 = vmatmul.msk.f32.gmra.mxu1 %vm327_vm1, %v2038_v41 }
  0xc9   : > { %1685 = vtanh.f32 %v436_v42 }
  0xce   : > { %v438_v43 = vpop.f32.mrf.mxu0 }
  0xcf   : > { %v2043_v44 = vpop.eup %1685  ;;  %v439_v45 = vadd.f32 %v2010_v22, %v438_v43 }
  0xd0   : > { %1558 = vmatmul.msk.f32.gmra.mxu1 %vm327_vm1, %v2043_v44 }
  0xd1   : > { %1687 = vtanh.f32 %v439_v45 }
  0xd6   : > { %v441_v46 = vpop.f32.mrf.mxu0 }
  0xd7   : > { %v2048_v47 = vpop.eup %1687  ;;  %v442_v48 = vadd.f32 %v2010_v22, %v441_v46 }
  0xd8   : > { %1559 = vmatmul.msk.f32.gmra.mxu1 %vm327_vm1, %v2048_v47 }
  0xd9   : > { %1689 = vtanh.f32 %v442_v48 }
  0xde   : > { %v444_v49 = vpop.f32.mrf.mxu0 }
  0xdf   : > { %v2053_v50 = vpop.eup %1689  ;;  %v445_v51 = vadd.f32 %v2010_v22, %v444_v49 }
  0xe0   : > { %1560 = vmatmul.msk.f32.gmra.mxu1 %vm327_vm1, %v2053_v50 }
  0xe1   : > { %1691 = vtanh.f32 %v445_v51 }
  0xe6   : > { %v447_v53 = vpop.f32.mrf.mxu0 }
  0xe7   : > { %v2065_v54 = vpop.eup %1691  ;;  %v448_v55 = vadd.f32 %v2010_v22, %v447_v53 }
  0xe8   : > { %1561 = vmatmul.msk.f32.gmra.mxu1 %vm327_vm1, %v2065_v54 }
  0xe9   : > { %1693 = vtanh.f32 %v448_v55 }
  0xee   : > { %v450_v57 = vpop.f32.mrf.mxu0 }
  0xef   : > { %v2077_v58 = vpop.eup %1693  ;;  %v451_v59 = vadd.f32 %v2010_v22, %v450_v57 }
  0xf0   : > { %1562 = vmatmul.msk.f32.gmra.mxu1 %vm327_vm1, %v2077_v58 }
  0xf1   : > { %1695 = vtanh.f32 %v451_v59 }
  0xf6   : > { %v453_v62 = vpop.f32.mrf.mxu0 }
  0xf7   : > { %v2093_v63 = vpop.eup %1695  ;;  %v454_v0 = vadd.f32 %v2010_v22, %v453_v62 }
  0xf8   : > { %1563 = vmatmul.msk.f32.gmra.mxu1 %vm327_vm1, %v2093_v63 }
  0xf9   : > { %1697 = vtanh.f32 %v454_v0 }
  0xfa   : > { %1699 = vtanh.f32 %v457_v3 }
  0xfb   : > { %1701 = vtanh.f32 %v460_v6 }
  0xfc   : > { %1703 = vtanh.f32 %v463_v9 }
  0xff   : > { %v2110_v5 = vpop.eup %1697 }
 0x100   : > { %1564 = vmatmul.msk.f32.vlgmr.msra.gmra.mxu2 %vm327_vm1, %v2110_v5  ;;  %v2118_v7 = vpop.eup %1699 }
 0x101   : > { %723 = vmatpush.msra.mxu2 %v2061_v52  ;;  %v2125_v10 = vpop.eup %1701 }
 0x102   : > { %v2129_v11 = vpop.eup %1703 }
 0x103   : > { %724 = vmatpush.msra.mxu2 %v2073_v56 }
 0x105   : > { %725 = vmatpush.msra.mxu2 %v2085_v60 }
 0x107   : > { %726 = vmatpush.msra.mxu2 %v2101_v2 }
 0x108   : > { %1565 = vmatmul.msk.f32.gmra.mxu2 %vm327_vm1, %v2118_v7 }
 0x110   : > { %1566 = vmatmul.msk.f32.gmra.mxu2 %vm327_vm1, %v2125_v10 }
 0x118   : > { %1567 = vmatmul.msk.f32.gmra.mxu2 %vm327_vm1, %v2129_v11 }
 0x11d   : > { %v555_v18 = vpop.f32.mrf.mxu1 }
 0x11e   : > { %v556_v19 = vadd.f32 %v2149_v17, %v555_v18 }
 0x120   : > { %1568 = vmatmul.msk.f32.vlgmr.msrb.gmra.mxu2 %vm327_vm1, %v607_v12 }
 0x121   : > { %827 = vmatpush.msrb.mxu2 %v2061_v52 }
 0x123   : > { %828 = vmatpush.msrb.mxu2 %v2073_v56 }
 0x125   : > { %829 = vmatpush.msrb.mxu2 %v2085_v60  ;;  %v558_v46 = vpop.f32.mrf.mxu1 }
 0x126   : > { %v559_v48 = vadd.f32 %v2149_v17, %v558_v46 }
 0x127   : > { %830 = vmatpush.msrb.mxu2 %v2101_v2 }
 0x183   : > { %v2138_v13 = vpop.f32.mrf.mxu2 }
 0x18b   : > { %v2140_v14 = vpop.f32.mrf.mxu2 }
 0x193   : > { %v2142_v15 = vpop.f32.mrf.mxu2 }
 0x19b   : > { %v2144_v16 = vpop.f32.mrf.mxu2 }
 0x1a3   : > { %v628_v20 = vpop.f32.mrf.mxu2 }
 0x1a4   : > { %v631_v21 = vadd.f32 %v628_v20, %v556_v19 }
 0x1a6   : > { %v1569_v22 = vmul.f32 -1.442695, %v631_v21  ;;  %v561_v21 = vpop.f32.mrf.mxu1 }
 0x1a8   : > { %1705 = vpow2.f32 %v1569_v22 }
 0x1ae   : > { %v1706_v23 = vpop.eup %1705 }
 0x1af   : > { %v635_v24 = vadd.f32 1.0, %v1706_v23 }
 0x1b1   : > { %1707 = vrcp.f32 %v635_v24  ;;  %v647_v30 = vand.u32 2147483648, %v635_v24  ;;  %v645_v33 = vand.u32 2147483647, %v635_v24  ;;  %vm641_vm3 = vweird.f32 %v635_v24 }
 0x1b3   : > { %v648_v36 = vor.u32 1.1754944e-38, %v647_v30  ;;  %vm646_vm5 = vcmp.eq.f32.partialorder %v645_v33, 8.507059e+37 }
 0x1b7   : > { %v1708_v25 = vpop.eup %1707 }
 0x1b8   : > { %v637_v27 = vmul.f32 %v1708_v25, %v635_v24  ;;  %vm642_vm2 = vweird.f32 %v1708_v25 }
 0x1b9   : > { %vm643_vm4 = vmor %vm641_vm3, %vm642_vm2 }
 0x1ba   : > { %v638_v28 = vsub.f32 1.0, %v637_v27 }
 0x1bc   : > { %v639_v31 = vmul.f32 %v1708_v25, %v638_v28 }
 0x1be   : > { %v640_v34 = vadd.f32 %v1708_v25, %v639_v31 }
 0x1c0   : > { %v644_v37 = vsel %vm643_vm4, %v1708_v25, %v640_v34 }
 0x1c1   : > { %v649_v39 = vsel %vm646_vm5, %v648_v36, %v644_v37  ;;  %vm811_vm5 = vcmask 1048320  }
 0x1c2   : > { %v652_v40 = vsub.f32 1.0, %v649_v39  ;;  %v651_v42 = vmul.f32 %v649_v39, %v607_v12 }
 0x1c4   : > { %v653_v43 = vmul.f32 %v2013_v26, %v652_v40 }
 0x1c6   : > { %v654_v45 = vadd.f32 %v653_v43, %v651_v42 }
 0x1c8   : > { %1570 = vmatmul.msk.f32.vlgmr.msrb.gmra.mxu3 %vm327_vm1, %v654_v45  ;;  %655 = vst.msk [vmem:[%s2157_s8] sm:$0xff] %vm327_vm1, %v654_v45 }
 0x1c9   : > { %875 = vmatpush.msrb.mxu3 %v2061_v52 }
 0x1cb   : > { %876 = vmatpush.msrb.mxu3 %v2073_v56 }
 0x1cd   : > { %877 = vmatpush.msrb.mxu3 %v2085_v60 }
 0x1cf   : > { %878 = vmatpush.msrb.mxu3 %v2101_v2 }
 0x24b   : > { %v676_v26 = vpop.f32.mrf.mxu3 }
 0x24c   : > { %v679_v49 = vadd.f32 %v676_v26, %v559_v48 }
 0x24e   : > { %v1571_v51 = vmul.f32 -1.442695, %v679_v49  ;;  %v564_v49 = vpop.f32.mrf.mxu1 }
 0x250   : > { %1709 = vpow2.f32 %v1571_v51 }
 0x256   : > { %v1710_v53 = vpop.eup %1709 }
 0x257   : > { %v683_v55 = vadd.f32 1.0, %v1710_v53 }
 0x259   : > { %1711 = vrcp.f32 %v683_v55  ;;  %v695_v62 = vand.u32 2147483648, %v683_v55  ;;  %v693_v1 = vand.u32 2147483647, %v683_v55  ;;  %vm689_vm7 = vweird.f32 %v683_v55 }
 0x25b   : > { %v696_v4 = vor.u32 1.1754944e-38, %v695_v62  ;;  %vm694_vm9 = vcmp.eq.f32.partialorder %v693_v1, 8.507059e+37 }
 0x25f   : > { %v1712_v57 = vpop.eup %1711 }
 0x260   : > { %v685_v59 = vmul.f32 %v1712_v57, %v683_v55  ;;  %vm690_vm6 = vweird.f32 %v1712_v57 }
 0x261   : > { %vm691_vm8 = vmor %vm689_vm7, %vm690_vm6 }
 0x262   : > { %v686_v61 = vsub.f32 1.0, %v685_v59 }
 0x264   : > { %v687_v0 = vmul.f32 %v1712_v57, %v686_v61 }
 0x266   : > { %v688_v3 = vadd.f32 %v1712_v57, %v687_v0 }
 0x268   : > { %v692_v6 = vsel %vm691_vm8, %v1712_v57, %v688_v3 }
 0x269   : > { %v697_v8 = vsel %vm694_vm9, %v696_v4, %v692_v6 }
 0x26a   : > { %v700_v9 = vsub.f32 1.0, %v697_v8  ;;  %v699_v12 = vmul.f32 %v697_v8, %v654_v45 }
 0x26c   : > { %v701_v18 = vmul.f32 %v2018_v29, %v700_v9  ;;  %v562_v29 = vadd.f32 %v2149_v17, %v561_v21 }
 0x26e   : > { %v702_v19 = vadd.f32 %v701_v18, %v699_v12 }
 0x270   : > { %704 = vrot.lane.b32.xlu0 %v702_v19, %s1849_s10  ;;  %1572 = vmatmul.msk.f32.vlgmr.msra.gmra.mxu2 %vm327_vm1, %v702_v19 }
 0x271   : > { %926 = vmatpush.msra.mxu2 %v2061_v52 }
 0x273   : > { %927 = vmatpush.msra.mxu2 %v2073_v56 }
 0x275   : > { %928 = vmatpush.msra.mxu2 %v2085_v60 }
 0x277   : > { %929 = vmatpush.msra.mxu2 %v2101_v2 }
 0x2e2   : > { %v705_v20 = vpop.permute.xlu0 %704 }
 0x2e3   : > { %708 = vst.msk [vmem:[%s2157_s8] sm:$0xff] %vm707_vm10, %v705_v20 }
 0x2f3   : > { %v728_v22 = vpop.f32.mrf.mxu2 }
 0x2f4   : > { %v731_v23 = vadd.f32 %v728_v22, %v562_v29  ;;  %v567_v22 = vpop.f32.mrf.mxu1 }
 0x2f6   : > { %v1573_v24 = vmul.f32 -1.442695, %v731_v23 }
 0x2f8   : > { %1713 = vpow2.f32 %v1573_v24 }
 0x2fe   : > { %v1714_v25 = vpop.eup %1713 }
 0x2ff   : > { %v735_v27 = vadd.f32 1.0, %v1714_v25 }
 0x301   : > { %1715 = vrcp.f32 %v735_v27  ;;  %v747_v33 = vand.u32 2147483648, %v735_v27  ;;  %v745_v36 = vand.u32 2147483647, %v735_v27  ;;  %vm741_vm12 = vweird.f32 %v735_v27 }
 0x303   : > { %v748_v39 = vor.u32 1.1754944e-38, %v747_v33  ;;  %vm746_vm14 = vcmp.eq.f32.partialorder %v745_v36, 8.507059e+37 }
 0x307   : > { %v1716_v28 = vpop.eup %1715 }
 0x308   : > { %v737_v30 = vmul.f32 %v1716_v28, %v735_v27  ;;  %vm742_vm11 = vweird.f32 %v1716_v28 }
 0x309   : > { %vm743_vm13 = vmor %vm741_vm12, %vm742_vm11 }
 0x30a   : > { %v738_v31 = vsub.f32 1.0, %v737_v30 }
 0x30c   : > { %v739_v34 = vmul.f32 %v1716_v28, %v738_v31 }
 0x30e   : > { %v740_v37 = vadd.f32 %v1716_v28, %v739_v34 }
 0x310   : > { %v744_v40 = vsel %vm743_vm13, %v1716_v28, %v740_v37 }
 0x311   : > { %v749_v42 = vsel %vm746_vm14, %v748_v39, %v744_v40 }
 0x312   : > { %v752_v43 = vsub.f32 1.0, %v749_v42  ;;  %v751_v45 = vmul.f32 %v749_v42, %v702_v19 }
 0x314   : > { %v753_v46 = vmul.f32 %v2023_v32, %v752_v43  ;;  %v565_v32 = vadd.f32 %v2149_v17, %v564_v49  ;;  %v570_v49 = vpop.f32.mrf.mxu1 }
 0x316   : > { %v754_v48 = vadd.f32 %v753_v46, %v751_v45 }
 0x318   : > { %756 = vrot.lane.b32.xlu2 %v754_v48, %s1850_s12  ;;  %1574 = vmatmul.msk.f32.vlgmr.msra.gmra.mxu3 %vm327_vm1, %v754_v48 }
 0x319   : > { %977 = vmatpush.msra.mxu3 %v2061_v52 }
 0x31b   : > { %978 = vmatpush.msra.mxu3 %v2073_v56 }
 0x31d   : > { %979 = vmatpush.msra.mxu3 %v2085_v60 }
 0x31f   : > { %980 = vmatpush.msra.mxu3 %v2101_v2 }
 0x372   : > { %v757_v26 = vpop.permute.xlu2 %756 }
 0x373   : > { %760 = vst.msk [vmem:[%s2157_s8] sm:$0xff] %vm759_vm15, %v757_v26 }
 0x39b   : > { %v780_v51 = vpop.f32.mrf.mxu3 }
 0x39c   : > { %v783_v53 = vadd.f32 %v780_v51, %v565_v32  ;;  %v571_v32 = vadd.f32 %v2149_v17, %v570_v49 }
 0x39e   : > { %v1575_v55 = vmul.f32 -1.442695, %v783_v53 }
 0x3a0   : > { %1717 = vpow2.f32 %v1575_v55 }
 0x3a6   : > { %v1718_v57 = vpop.eup %1717 }
 0x3a7   : > { %v787_v59 = vadd.f32 1.0, %v1718_v57 }
 0x3a9   : > { %1719 = vrcp.f32 %v787_v59  ;;  %v799_v1 = vand.u32 2147483648, %v787_v59  ;;  %v797_v4 = vand.u32 2147483647, %v787_v59  ;;  %vm793_vm2 = vweird.f32 %v787_v59 }
 0x3ab   : > { %v800_v8 = vor.u32 1.1754944e-38, %v799_v1  ;;  %vm798_vm4 = vcmp.eq.f32.partialorder %v797_v4, 8.507059e+37 }
 0x3af   : > { %v1720_v61 = vpop.eup %1719 }
 0x3b0   : > { %v789_v62 = vmul.f32 %v1720_v61, %v787_v59  ;;  %vm794_vm0 = vweird.f32 %v1720_v61 }
 0x3b1   : > { %vm795_vm3 = vmor %vm793_vm2, %vm794_vm0 }
 0x3b2   : > { %v790_v0 = vsub.f32 1.0, %v789_v62 }
 0x3b4   : > { %v791_v3 = vmul.f32 %v1720_v61, %v790_v0 }
 0x3b6   : > { %v792_v6 = vadd.f32 %v1720_v61, %v791_v3 }
 0x3b8   : > { %v796_v9 = vsel %vm795_vm3, %v1720_v61, %v792_v6 }
 0x3b9   : > { %v801_v12 = vsel %vm798_vm4, %v800_v8, %v796_v9 }
 0x3ba   : > { %v804_v18 = vsub.f32 1.0, %v801_v12  ;;  %v803_v19 = vmul.f32 %v801_v12, %v754_v48 }
 0x3bc   : > { %v805_v20 = vmul.f32 %v2028_v35, %v804_v18  ;;  %v568_v35 = vadd.f32 %v2149_v17, %v567_v22 }
 0x3be   : > { %v806_v21 = vadd.f32 %v805_v20, %v803_v19 }
 0x3c0   : > { %808 = vrot.lane.b32.xlu2 %v806_v21, %s1851_s15  ;;  %1576 = vmatmul.msk.f32.vlgmr.msrb.gmra.mxu2 %vm327_vm1, %v806_v21 }
 0x3c1   : > { %1028 = vmatpush.msrb.mxu2 %v2061_v52 }
 0x3c3   : > { %1029 = vmatpush.msrb.mxu2 %v2073_v56 }
 0x3c5   : > { %1030 = vmatpush.msrb.mxu2 %v2085_v60 }
 0x3c7   : > { %1031 = vmatpush.msrb.mxu2 %v2101_v2 }
 0x41a   : > { %v809_v29 = vpop.permute.xlu2 %808 }
 0x41b   : > { %812 = vst.msk [vmem:[%s2157_s8] sm:$0xff] %vm811_vm5, %v809_v29  ;;  %v573_v29 = vpop.f32.mrf.mxu1 }
 0x41c   : > { %v574_v22 = vadd.f32 %v2149_v17, %v573_v29 }
 0x443   : > { %v832_v23 = vpop.f32.mrf.mxu2 }
 0x444   : > { %v835_v24 = vadd.f32 %v832_v23, %v568_v35 }
 0x446   : > { %v1577_v25 = vmul.f32 -1.442695, %v835_v24 }
 0x448   : > { %1721 = vpow2.f32 %v1577_v25 }
 0x44e   : > { %v1722_v27 = vpop.eup %1721 }
 0x44f   : > { %v839_v28 = vadd.f32 1.0, %v1722_v27 }
 0x451   : > { %1723 = vrcp.f32 %v839_v28  ;;  %v851_v34 = vand.u32 2147483648, %v839_v28  ;;  %v849_v37 = vand.u32 2147483647, %v839_v28  ;;  %vm845_vm7 = vweird.f32 %v839_v28 }
 0x453   : > { %v852_v40 = vor.u32 1.1754944e-38, %v851_v34  ;;  %vm850_vm9 = vcmp.eq.f32.partialorder %v849_v37, 8.507059e+37 }
 0x457   : > { %v1724_v30 = vpop.eup %1723 }
 0x458   : > { %v841_v31 = vmul.f32 %v1724_v30, %v839_v28  ;;  %vm846_vm6 = vweird.f32 %v1724_v30 }
 0x459   : > { %vm847_vm8 = vmor %vm845_vm7, %vm846_vm6 }
 0x45a   : > { %v842_v33 = vsub.f32 1.0, %v841_v31 }
 0x45c   : > { %v843_v36 = vmul.f32 %v1724_v30, %v842_v33 }
 0x45e   : > { %v844_v39 = vadd.f32 %v1724_v30, %v843_v36 }
 0x460   : > { %v848_v42 = vsel %vm847_vm8, %v1724_v30, %v844_v39 }
 0x461   : > { %v853_v43 = vsel %vm850_vm9, %v852_v40, %v848_v42 }
 0x462   : > { %v856_v45 = vsub.f32 1.0, %v853_v43  ;;  %v855_v46 = vmul.f32 %v853_v43, %v806_v21 }
 0x464   : > { %v857_v48 = vmul.f32 %v2033_v38, %v856_v45 }
 0x466   : > { %v858_v26 = vadd.f32 %v857_v48, %v855_v46 }
 0x468   : > { %1578 = vmatmul.msk.f32.vlgmr.msrb.gmra.mxu3 %vm327_vm1, %v858_v26  ;;  %859 = vst.msk [vmem:[%s2157_s8 + $0x8] sm:$0xff] %vm327_vm1, %v858_v26 }
 0x469   : > { %1076 = vmatpush.msrb.mxu3 %v2061_v52 }
 0x46b   : > { %1077 = vmatpush.msrb.mxu3 %v2073_v56 }
 0x46d   : > { %1078 = vmatpush.msrb.mxu3 %v2085_v60 }
 0x46f   : > { %1079 = vmatpush.msrb.mxu3 %v2101_v2 }
 0x4eb   : > { %v880_v51 = vpop.f32.mrf.mxu3 }
 0x4ec   : > { %v883_v53 = vadd.f32 %v880_v51, %v571_v32 }
 0x4ee   : > { %v1579_v55 = vmul.f32 -1.442695, %v883_v53 }
 0x4f0   : > { %1725 = vpow2.f32 %v1579_v55 }
 0x4f6   : > { %v1726_v38 = vpop.eup %1725 }
 0x4f7   : > { %v887_v57 = vadd.f32 1.0, %v1726_v38 }
 0x4f9   : > { %1727 = vrcp.f32 %v887_v57  ;;  %v899_v0 = vand.u32 2147483648, %v887_v57  ;;  %v897_v3 = vand.u32 2147483647, %v887_v57  ;;  %vm893_vm12 = vweird.f32 %v887_v57 }
 0x4fb   : > { %v900_v6 = vor.u32 1.1754944e-38, %v899_v0  ;;  %vm898_vm14 = vcmp.eq.f32.partialorder %v897_v3, 8.507059e+37 }
 0x4ff   : > { %v1728_v59 = vpop.eup %1727 }
 0x500   : > { %v889_v61 = vmul.f32 %v1728_v59, %v887_v57  ;;  %vm894_vm11 = vweird.f32 %v1728_v59 }
 0x501   : > { %vm895_vm13 = vmor %vm893_vm12, %vm894_vm11 }
 0x502   : > { %v890_v62 = vsub.f32 1.0, %v889_v61 }
 0x504   : > { %v891_v1 = vmul.f32 %v1728_v59, %v890_v62 }
 0x506   : > { %v892_v4 = vadd.f32 %v1728_v59, %v891_v1 }
 0x508   : > { %v896_v8 = vsel %vm895_vm13, %v1728_v59, %v892_v4 }
 0x509   : > { %v901_v9 = vsel %vm898_vm14, %v900_v6, %v896_v8 }
 0x50a   : > { %v904_v12 = vsub.f32 1.0, %v901_v9  ;;  %v903_v18 = vmul.f32 %v901_v9, %v858_v26  ;;  %v576_v26 = vpop.f32.mrf.mxu1 }
 0x50b   : > { %v577_v49 = vadd.f32 %v2149_v17, %v576_v26 }
 0x50c   : > { %v905_v19 = vmul.f32 %v2038_v41, %v904_v12 }
 0x50e   : > { %v906_v20 = vadd.f32 %v905_v19, %v903_v18 }
 0x510   : > { %908 = vrot.lane.b32.xlu0 %v906_v20, %s1849_s10  ;;  %1580 = vmatmul.msk.f32.vlgmr.msra.gmra.mxu2 %vm327_vm1, %v906_v20 }
 0x511   : > { %1127 = vmatpush.msra.mxu2 %v2061_v52 }
 0x512   : > { %v579_v19 = vpop.f32.mrf.mxu1 }
 0x513   : > { %1128 = vmatpush.msra.mxu2 %v2073_v56 }
 0x515   : > { %1129 = vmatpush.msra.mxu2 %v2085_v60 }
 0x517   : > { %1130 = vmatpush.msra.mxu2 %v2101_v2 }
 0x582   : > { %v909_v21 = vpop.permute.xlu0 %908 }
 0x583   : > { %911 = vst.msk [vmem:[%s2157_s8 + $0x8] sm:$0xff] %vm707_vm10, %v909_v21 }
 0x593   : > { %v931_v41 = vpop.f32.mrf.mxu2 }
 0x594   : > { %v934_v35 = vadd.f32 %v931_v41, %v574_v22 }
 0x596   : > { %v1581_v23 = vmul.f32 -1.442695, %v934_v35 }
 0x598   : > { %1729 = vpow2.f32 %v1581_v23 }
 0x59e   : > { %v1730_v24 = vpop.eup %1729 }
 0x59f   : > { %v938_v25 = vadd.f32 1.0, %v1730_v24 }
 0x5a1   : > { %1731 = vrcp.f32 %v938_v25  ;;  %v950_v31 = vand.u32 2147483648, %v938_v25  ;;  %v948_v34 = vand.u32 2147483647, %v938_v25  ;;  %vm944_vm2 = vweird.f32 %v938_v25 }
 0x5a3   : > { %v951_v37 = vor.u32 1.1754944e-38, %v950_v31  ;;  %vm949_vm4 = vcmp.eq.f32.partialorder %v948_v34, 8.507059e+37 }
 0x5a7   : > { %v1732_v27 = vpop.eup %1731 }
 0x5a8   : > { %v940_v28 = vmul.f32 %v1732_v27, %v938_v25  ;;  %vm945_vm0 = vweird.f32 %v1732_v27 }
 0x5a9   : > { %vm946_vm3 = vmor %vm944_vm2, %vm945_vm0 }
 0x5aa   : > { %v941_v30 = vsub.f32 1.0, %v940_v28 }
 0x5ac   : > { %v942_v33 = vmul.f32 %v1732_v27, %v941_v30 }
 0x5ae   : > { %v943_v36 = vadd.f32 %v1732_v27, %v942_v33 }
 0x5b0   : > { %v947_v39 = vsel %vm946_vm3, %v1732_v27, %v943_v36 }
 0x5b1   : > { %v952_v40 = vsel %vm949_vm4, %v951_v37, %v947_v39 }
 0x5b2   : > { %v955_v42 = vsub.f32 1.0, %v952_v40  ;;  %v954_v43 = vmul.f32 %v952_v40, %v906_v20  ;;  %v580_v20 = vadd.f32 %v2149_v17, %v579_v19 }
 0x5b4   : > { %v956_v45 = vmul.f32 %v2043_v44, %v955_v42  ;;  %v582_v42 = vpop.f32.mrf.mxu1 }
 0x5b6   : > { %v957_v46 = vadd.f32 %v956_v45, %v954_v43  ;;  %v583_v43 = vadd.f32 %v2149_v17, %v582_v42 }
 0x5b8   : > { %959 = vrot.lane.b32.xlu2 %v957_v46, %s1850_s12  ;;  %1582 = vmatmul.msk.f32.vlgmr.msra.gmra.mxu3 %vm327_vm1, %v957_v46 }
 0x5b9   : > { %1178 = vmatpush.msra.mxu3 %v2061_v52 }
 0x5bb   : > { %1179 = vmatpush.msra.mxu3 %v2073_v56 }
 0x5bd   : > { %1180 = vmatpush.msra.mxu3 %v2085_v60 }
 0x5bf   : > { %1181 = vmatpush.msra.mxu3 %v2101_v2 }
 0x612   : > { %v960_v48 = vpop.permute.xlu2 %959 }
 0x613   : > { %962 = vst.msk [vmem:[%s2157_s8 + $0x8] sm:$0xff] %vm759_vm15, %v960_v48 }
 0x63b   : > { %v982_v44 = vpop.f32.mrf.mxu3 }
 0x63c   : > { %v985_v32 = vadd.f32 %v982_v44, %v577_v49 }
 0x63e   : > { %v1583_v51 = vmul.f32 -1.442695, %v985_v32 }
 0x640   : > { %1733 = vpow2.f32 %v1583_v51 }
 0x646   : > { %v1734_v53 = vpop.eup %1733 }
 0x647   : > { %v989_v55 = vadd.f32 1.0, %v1734_v53 }
 0x649   : > { %1735 = vrcp.f32 %v989_v55  ;;  %v1001_v61 = vand.u32 2147483648, %v989_v55  ;;  %v999_v0 = vand.u32 2147483647, %v989_v55  ;;  %vm995_vm7 = vweird.f32 %v989_v55 }
 0x64b   : > { %v1002_v3 = vor.u32 1.1754944e-38, %v1001_v61  ;;  %vm1000_vm9 = vcmp.eq.f32.partialorder %v999_v0, 8.507059e+37 }
 0x64f   : > { %v1736_v38 = vpop.eup %1735 }
 0x650   : > { %v991_v57 = vmul.f32 %v1736_v38, %v989_v55  ;;  %vm996_vm6 = vweird.f32 %v1736_v38 }
 0x651   : > { %vm997_vm8 = vmor %vm995_vm7, %vm996_vm6 }
 0x652   : > { %v992_v59 = vsub.f32 1.0, %v991_v57 }
 0x654   : > { %v993_v62 = vmul.f32 %v1736_v38, %v992_v59 }
 0x656   : > { %v994_v1 = vadd.f32 %v1736_v38, %v993_v62 }
 0x658   : > { %v998_v4 = vsel %vm997_vm8, %v1736_v38, %v994_v1 }
 0x659   : > { %v1003_v6 = vsel %vm1000_vm9, %v1002_v3, %v998_v4 }
 0x65a   : > { %v1006_v8 = vsub.f32 1.0, %v1003_v6  ;;  %v1005_v9 = vmul.f32 %v1003_v6, %v957_v46  ;;  %v585_v6 = vpop.f32.mrf.mxu1 }
 0x65c   : > { %v1007_v12 = vmul.f32 %v2048_v47, %v1006_v8  ;;  %v586_v8 = vadd.f32 %v2149_v17, %v585_v6 }
 0x65e   : > { %v2226_v18 = vadd.f32 %v1007_v12, %v1005_v9 }
 0x660   : > { %1584 = vmatmul.msk.f32.vlgmr.msrb.gmra.mxu2 %vm327_vm1, %v2226_v18 }
 0x661   : > { %1229 = vmatpush.msrb.mxu2 %v2061_v52 }
 0x663   : > { %1230 = vmatpush.msrb.mxu2 %v2073_v56 }
 0x665   : > { %1231 = vmatpush.msrb.mxu2 %v2085_v60 }
 0x667   : > { %1232 = vmatpush.msrb.mxu2 %v2101_v2 }
 0x6e3   : > { %v1033_v21 = vpop.f32.mrf.mxu2 }
 0x6e4   : > { %v1036_v29 = vadd.f32 %v1033_v21, %v580_v20 }
 0x6e6   : > { %v1585_v22 = vmul.f32 -1.442695, %v1036_v29 }
 0x6e8   : > { %1737 = vpow2.f32 %v1585_v22 }
 0x6ee   : > { %v1738_v47 = vpop.eup %1737 }
 0x6ef   : > { %v1040_v41 = vadd.f32 1.0, %v1738_v47 }
 0x6f1   : > { %1739 = vrcp.f32 %v1040_v41  ;;  %v1052_v25 = vand.u32 2147483648, %v1040_v41  ;;  %v1050_v28 = vand.u32 2147483647, %v1040_v41  ;;  %vm1046_vm12 = vweird.f32 %v1040_v41 }
 0x6f3   : > { %v1053_v31 = vor.u32 1.1754944e-38, %v1052_v25  ;;  %vm1051_vm14 = vcmp.eq.f32.partialorder %v1050_v28, 8.507059e+37 }
 0x6f7   : > { %v1740_v35 = vpop.eup %1739 }
 0x6f8   : > { %v1042_v23 = vmul.f32 %v1740_v35, %v1040_v41  ;;  %vm1047_vm11 = vweird.f32 %v1740_v35 }
 0x6f9   : > { %vm1048_vm13 = vmor %vm1046_vm12, %vm1047_vm11 }
 0x6fa   : > { %v1043_v24 = vsub.f32 1.0, %v1042_v23 }
 0x6fc   : > { %v1044_v27 = vmul.f32 %v1740_v35, %v1043_v24 }
 0x6fe   : > { %v1045_v30 = vadd.f32 %v1740_v35, %v1044_v27 }
 0x700   : > { %v1049_v33 = vsel %vm1048_vm13, %v1740_v35, %v1045_v30 }
 0x701   : > { %v1054_v34 = vsel %vm1051_vm14, %v1053_v31, %v1049_v33 }
 0x702   : > { %v1057_v36 = vsub.f32 1.0, %v1054_v34  ;;  %v1056_v37 = vmul.f32 %v1054_v34, %v2226_v18 }
 0x704   : > { %v1058_v39 = vmul.f32 %v2053_v50, %v1057_v36  ;;  %v588_v36 = vpop.f32.mrf.mxu1 }
 0x706   : > { %v1059_v40 = vadd.f32 %v1058_v39, %v1056_v37  ;;  %v589_v37 = vadd.f32 %v2149_v17, %v588_v36 }
 0x708   : > { %1586 = vmatmul.msk.f32.vlgmr.msrb.gmra.mxu3 %vm327_vm1, %v1059_v40  ;;  %1060 = vst.msk [vmem:[%s2157_s8 + $0x10] sm:$0xff] %vm327_vm1, %v1059_v40 }
 0x709   : > { %1277 = vmatpush.msrb.mxu3 %v2061_v52 }
 0x70b   : > { %1278 = vmatpush.msrb.mxu3 %v2073_v56 }
 0x70d   : > { %1279 = vmatpush.msrb.mxu3 %v2085_v60 }
 0x70f   : > { %1280 = vmatpush.msrb.mxu3 %v2101_v2 }
 0x78b   : > { %v1081_v45 = vpop.f32.mrf.mxu3 }
 0x78c   : > { %v1084_v46 = vadd.f32 %v1081_v45, %v583_v43 }
 0x78e   : > { %v1587_v48 = vmul.f32 -1.442695, %v1084_v46 }
 0x790   : > { %1741 = vpow2.f32 %v1587_v48 }
 0x796   : > { %v1742_v50 = vpop.eup %1741 }
 0x797   : > { %v1088_v26 = vadd.f32 1.0, %v1742_v50 }
 0x799   : > { %1743 = vrcp.f32 %v1088_v26  ;;  %v1100_v51 = vand.u32 2147483648, %v1088_v26  ;;  %v1098_v55 = vand.u32 2147483647, %v1088_v26  ;;  %vm1094_vm2 = vweird.f32 %v1088_v26 }
 0x79b   : > { %v1101_v57 = vor.u32 1.1754944e-38, %v1100_v51  ;;  %vm1099_vm4 = vcmp.eq.f32.partialorder %v1098_v55, 8.507059e+37  ;;  %v592_v55 = vadd.f32 %v2149_v17, %v2138_v13 }
 0x79f   : > { %v1744_v49 = vpop.eup %1743 }
 0x7a0   : > { %v1090_v44 = vmul.f32 %v1744_v49, %v1088_v26  ;;  %vm1095_vm0 = vweird.f32 %v1744_v49 }
 0x7a1   : > { %vm1096_vm3 = vmor %vm1094_vm2, %vm1095_vm0 }
 0x7a2   : > { %v1091_v32 = vsub.f32 1.0, %v1090_v44 }
 0x7a4   : > { %v1092_v53 = vmul.f32 %v1744_v49, %v1091_v32 }
 0x7a6   : > { %v1093_v38 = vadd.f32 %v1744_v49, %v1092_v53 }
 0x7a8   : > { %v1097_v59 = vsel %vm1096_vm3, %v1744_v49, %v1093_v38 }
 0x7a9   : > { %v1102_v61 = vsel %vm1099_vm4, %v1101_v57, %v1097_v59 }
 0x7aa   : > { %v1105_v62 = vsub.f32 1.0, %v1102_v61  ;;  %v1104_v0 = vmul.f32 %v1102_v61, %v1059_v40 }
 0x7ac   : > { %v1106_v1 = vmul.f32 %v2065_v54, %v1105_v62 }
 0x7ae   : > { %v1107_v3 = vadd.f32 %v1106_v1, %v1104_v0 }
 0x7b0   : > { %1109 = vrot.lane.b32.xlu1 %v1107_v3, %s1849_s10  ;;  %1588 = vmatmul.msk.f32.vlgmr.msra.gmra.mxu2 %vm327_vm1, %v1107_v3 }
 0x7b1   : > { %1328 = vmatpush.msra.mxu2 %v2061_v52 }
 0x7b3   : > { %1329 = vmatpush.msra.mxu2 %v2073_v56 }
 0x7b5   : > { %1330 = vmatpush.msra.mxu2 %v2085_v60 }
 0x7b7   : > { %1331 = vmatpush.msra.mxu2 %v2101_v2 }
 0x822   : > { %v1110_v4 = vpop.permute.xlu1 %1109 }
 0x823   : > { %1112 = vst.msk [vmem:[%s2157_s8 + $0x10] sm:$0xff] %vm707_vm10, %v1110_v4 }
 0x833   : > { %v1132_v54 = vpop.f32.mrf.mxu2 }
 0x834   : > { %v1135_v9 = vadd.f32 %v1132_v54, %v586_v8 }
 0x836   : > { %v1589_v12 = vmul.f32 -1.442695, %v1135_v9 }
 0x838   : > { %1745 = vpow2.f32 %v1589_v12 }
 0x83e   : > { %v1746_v19 = vpop.eup %1745 }
 0x83f   : > { %v1139_v20 = vadd.f32 1.0, %v1746_v19 }
 0x841   : > { %1747 = vrcp.f32 %v1139_v20  ;;  %v1151_v47 = vand.u32 2147483648, %v1139_v20  ;;  %v1149_v35 = vand.u32 2147483647, %v1139_v20  ;;  %vm1145_vm7 = vweird.f32 %v1139_v20 }
 0x843   : > { %v1152_v24 = vor.u32 1.1754944e-38, %v1151_v47  ;;  %vm1150_vm9 = vcmp.eq.f32.partialorder %v1149_v35, 8.507059e+37 }
 0x847   : > { %v1748_v21 = vpop.eup %1747 }
 0x848   : > { %v1141_v29 = vmul.f32 %v1748_v21, %v1139_v20  ;;  %vm1146_vm6 = vweird.f32 %v1748_v21 }
 0x849   : > { %vm1147_vm8 = vmor %vm1145_vm7, %vm1146_vm6 }
 0x84a   : > { %v1142_v22 = vsub.f32 1.0, %v1141_v29  ;;  %v595_v29 = vadd.f32 %v2149_v17, %v2140_v14 }
 0x84c   : > { %v1143_v41 = vmul.f32 %v1748_v21, %v1142_v22 }
 0x84e   : > { %v1144_v23 = vadd.f32 %v1748_v21, %v1143_v41 }
 0x850   : > { %v1148_v25 = vsel %vm1147_vm8, %v1748_v21, %v1144_v23 }
 0x851   : > { %v1153_v27 = vsel %vm1150_vm9, %v1152_v24, %v1148_v25 }
 0x852   : > { %v1156_v28 = vsub.f32 1.0, %v1153_v27  ;;  %v1155_v30 = vmul.f32 %v1153_v27, %v1107_v3 }
 0x854   : > { %v1157_v31 = vmul.f32 %v2077_v58, %v1156_v28 }
 0x856   : > { %v1158_v33 = vadd.f32 %v1157_v31, %v1155_v30 }
 0x858   : > { %1160 = vrot.lane.b32.xlu0 %v1158_v33, %s1850_s12  ;;  %1590 = vmatmul.msk.f32.vlgmr.msra.gmra.mxu3 %vm327_vm1, %v1158_v33 }
 0x859   : > { %1379 = vmatpush.msra.mxu3 %v2061_v52 }
 0x85b   : > { %1380 = vmatpush.msra.mxu3 %v2073_v56 }
 0x85d   : > { %1381 = vmatpush.msra.mxu3 %v2085_v60 }
 0x85f   : > { %1382 = vmatpush.msra.mxu3 %v2101_v2 }
 0x860   : > { %1010 = vrot.lane.b32.xlu0 %v2226_v18, %s1851_s15 }
 0x8ca   : > { %v1161_v34 = vpop.permute.xlu0 %1160 }
 0x8cb   : > { %1163 = vst.msk [vmem:[%s2157_s8 + $0x10] sm:$0xff] %vm759_vm15, %v1161_v34 }
 0x8d2   : > { %v1011_v58 = vpop.permute.xlu0 %1010 }
 0x8d3   : > { %1013 = vst.msk [vmem:[%s2157_s8 + $0x8] sm:$0xff] %vm811_vm5, %v1011_v58 }
 0x8db   : > { %v1183_v39 = vpop.f32.mrf.mxu3 }
 0x8dc   : > { %v1186_v52 = vadd.f32 %v1183_v39, %v589_v37 }
 0x8de   : > { %v1591_v40 = vmul.f32 -1.442695, %v1186_v52 }
 0x8e0   : > { %1749 = vpow2.f32 %v1591_v40  ;;  %v598_v40 = vadd.f32 %v2149_v17, %v2142_v15 }
 0x8e6   : > { %v1750_v56 = vpop.eup %1749 }
 0x8e7   : > { %v1190_v60 = vadd.f32 1.0, %v1750_v56 }
 0x8e9   : > { %1751 = vrcp.f32 %v1190_v60  ;;  %v1202_v18 = vand.u32 2147483648, %v1190_v60  ;;  %v1200_v46 = vand.u32 2147483647, %v1190_v60  ;;  %vm1196_vm12 = vweird.f32 %v1190_v60 }
 0x8eb   : > { %v1203_v50 = vor.u32 1.1754944e-38, %v1202_v18  ;;  %vm1201_vm14 = vcmp.eq.f32.partialorder %v1200_v46, 8.507059e+37 }
 0x8ef   : > { %v1752_v2 = vpop.eup %1751 }
 0x8f0   : > { %v1192_v42 = vmul.f32 %v1752_v2, %v1190_v60  ;;  %vm1197_vm11 = vweird.f32 %v1752_v2 }
 0x8f1   : > { %vm1198_vm13 = vmor %vm1196_vm12, %vm1197_vm11 }
 0x8f2   : > { %v1193_v43 = vsub.f32 1.0, %v1192_v42 }
 0x8f4   : > { %v1194_v45 = vmul.f32 %v1752_v2, %v1193_v43 }
 0x8f6   : > { %v1195_v48 = vadd.f32 %v1752_v2, %v1194_v45 }
 0x8f8   : > { %v1199_v26 = vsel %vm1198_vm13, %v1752_v2, %v1195_v48 }
 0x8f9   : > { %v1204_v49 = vsel %vm1201_vm14, %v1203_v50, %v1199_v26 }
 0x8fa   : > { %v1207_v44 = vsub.f32 1.0, %v1204_v49  ;;  %v1206_v32 = vmul.f32 %v1204_v49, %v1158_v33 }
 0x8fc   : > { %v1208_v51 = vmul.f32 %v2093_v63, %v1207_v44 }
 0x8fe   : > { %v2270_v53 = vadd.f32 %v1208_v51, %v1206_v32 }
 0x900   : > { %1592 = vmatmul.msk.f32.vlgmr.msrb.gmra.mxu2 %vm327_vm1, %v2270_v53 }
 0x983   : > { %v1234_v38 = vpop.f32.mrf.mxu2 }
 0x984   : > { %v1237_v57 = vadd.f32 %v1234_v38, %v592_v55 }
 0x986   : > { %v1593_v59 = vmul.f32 -1.442695, %v1237_v57 }
 0x988   : > { %1753 = vpow2.f32 %v1593_v59 }
 0x98e   : > { %v1754_v61 = vpop.eup %1753 }
 0x98f   : > { %v1241_v62 = vadd.f32 1.0, %v1754_v61  ;;  %v601_v61 = vadd.f32 %v2149_v17, %v2144_v16 }
 0x991   : > { %1755 = vrcp.f32 %v1241_v62  ;;  %v1253_v4 = vand.u32 2147483648, %v1241_v62  ;;  %v1251_v6 = vand.u32 2147483647, %v1241_v62  ;;  %vm1247_vm2 = vweird.f32 %v1241_v62 }
 0x993   : > { %v1254_v54 = vor.u32 1.1754944e-38, %v1253_v4  ;;  %vm1252_vm4 = vcmp.eq.f32.partialorder %v1251_v6, 8.507059e+37 }
 0x997   : > { %v1756_v0 = vpop.eup %1755 }
 0x998   : > { %v1243_v1 = vmul.f32 %v1756_v0, %v1241_v62  ;;  %vm1248_vm0 = vweird.f32 %v1756_v0 }
 0x999   : > { %vm1249_vm3 = vmor %vm1247_vm2, %vm1248_vm0 }
 0x99a   : > { %v1244_v3 = vsub.f32 1.0, %v1243_v1 }
 0x99c   : > { %v1245_v63 = vmul.f32 %v1756_v0, %v1244_v3 }
 0x99e   : > { %v1246_v8 = vadd.f32 %v1756_v0, %v1245_v63 }
 0x9a0   : > { %v1250_v13 = vsel %vm1249_vm3, %v1756_v0, %v1246_v8 }
 0x9a1   : > { %v1255_v9 = vsel %vm1252_vm4, %v1254_v54, %v1250_v13 }
 0x9a2   : > { %v1258_v12 = vsub.f32 1.0, %v1255_v9  ;;  %v1257_v19 = vmul.f32 %v1255_v9, %v2270_v53 }
 0x9a4   : > { %v1259_v20 = vmul.f32 %v2110_v5, %v1258_v12 }
 0x9a6   : > { %v1260_v21 = vadd.f32 %v1259_v20, %v1257_v19 }
 0x9a8   : > { %1594 = vmatmul.msk.f32.vlgmr.msrb.gmra.mxu3 %vm327_vm1, %v1260_v21  ;;  %1261 = vst.msk [vmem:[%s2157_s8 + $0x18] sm:$0xff] %vm327_vm1, %v1260_v21 }
 0xa2b   : > { %v1282_v22 = vpop.f32.mrf.mxu3 }
 0xa2c   : > { %v1285_v47 = vadd.f32 %v1282_v22, %v595_v29 }
 0xa2e   : > { %v1595_v41 = vmul.f32 -1.442695, %v1285_v47 }
 0xa30   : > { %1757 = vpow2.f32 %v1595_v41 }
 0xa36   : > { %v1758_v35 = vpop.eup %1757 }
 0xa37   : > { %v1289_v23 = vadd.f32 1.0, %v1758_v35 }
 0xa39   : > { %1759 = vrcp.f32 %v1289_v23  ;;  %v1301_v28 = vand.u32 2147483648, %v1289_v23  ;;  %v1299_v30 = vand.u32 2147483647, %v1289_v23  ;;  %vm1295_vm7 = vweird.f32 %v1289_v23 }
 0xa3b   : > { %v1302_v33 = vor.u32 1.1754944e-38, %v1301_v28  ;;  %vm1300_vm9 = vcmp.eq.f32.partialorder %v1299_v30, 8.507059e+37 }
 0xa3f   : > { %v1760_v24 = vpop.eup %1759 }
 0xa40   : > { %v1291_v25 = vmul.f32 %v1760_v24, %v1289_v23  ;;  %vm1296_vm6 = vweird.f32 %v1760_v24 }
 0xa41   : > { %vm1297_vm8 = vmor %vm1295_vm7, %vm1296_vm6 }
 0xa42   : > { %v1292_v27 = vsub.f32 1.0, %v1291_v25 }
 0xa44   : > { %v1293_v5 = vmul.f32 %v1760_v24, %v1292_v27 }
 0xa46   : > { %v1294_v31 = vadd.f32 %v1760_v24, %v1293_v5 }
 0xa48   : > { %v1298_v14 = vsel %vm1297_vm8, %v1760_v24, %v1294_v31 }
 0xa49   : > { %v1303_v34 = vsel %vm1300_vm9, %v1302_v33, %v1298_v14 }
 0xa4a   : > { %v1306_v58 = vsub.f32 1.0, %v1303_v34  ;;  %v1305_v36 = vmul.f32 %v1303_v34, %v1260_v21 }
 0xa4c   : > { %v1307_v37 = vmul.f32 %v2118_v7, %v1306_v58 }
 0xa4e   : > { %v1308_v39 = vadd.f32 %v1307_v37, %v1305_v36 }
 0xa50   : > { %1310 = vrot.lane.b32.xlu1 %v1308_v39, %s1849_s10  ;;  %1596 = vmatmul.msk.f32.vlgmr.msra.gmra.mxu2 %vm327_vm1, %v1308_v39  ;;  %s1785_s10 = scalar_lea.hbm %s1784_s30, 32 }
 0xa51   : > { %p1786_p12 = scmp.ne.s32.totalorder %s1784_s30, %s1785_s10 }
 0xa53   : > { %p1787_p13 = pnand %p1786_p12, %p1932_p4 }
 0xa55   : > { %p1788_p0 = pneg %p1787_p13 }
 0xac2   : > { %v1311_v52 = vpop.permute.xlu1 %1310 }
 0xac3   : > { %1313 = vst.msk [vmem:[%s2157_s8 + $0x18] sm:$0xff] %vm707_vm10, %v1311_v52 }
 0xad3   : > { %v1333_v56 = vpop.f32.mrf.mxu2 }
 0xad4   : > { %v1336_v60 = vadd.f32 %v1333_v56, %v598_v40 }
 0xad6   : > { %v1597_v2 = vmul.f32 -1.442695, %v1336_v60 }
 0xad8   : > { %1761 = vpow2.f32 %v1597_v2 }
 0xade   : > { %v1762_v42 = vpop.eup %1761 }
 0xadf   : > { %v1340_v43 = vadd.f32 1.0, %v1762_v42 }
 0xae1   : > { %1763 = vrcp.f32 %v1340_v43  ;;  %v1352_v46 = vand.u32 2147483648, %v1340_v43  ;;  %v1350_v50 = vand.u32 2147483647, %v1340_v43  ;;  %vm1346_vm10 = vweird.f32 %v1340_v43 }
 0xae3   : > { %v1353_v15 = vor.u32 1.1754944e-38, %v1352_v46  ;;  %vm1351_vm13 = vcmp.eq.f32.partialorder %v1350_v50, 8.507059e+37 }
 0xae7   : > { %v1764_v18 = vpop.eup %1763 }
 0xae8   : > { %v1342_v7 = vmul.f32 %v1764_v18, %v1340_v43  ;;  %vm1347_vm11 = vweird.f32 %v1764_v18 }
 0xae9   : > { %vm1348_vm12 = vmor %vm1346_vm10, %vm1347_vm11 }
 0xaea   : > { %v1343_v45 = vsub.f32 1.0, %v1342_v7 }
 0xaec   : > { %v1344_v48 = vmul.f32 %v1764_v18, %v1343_v45 }
 0xaee   : > { %v1345_v26 = vadd.f32 %v1764_v18, %v1344_v48 }
 0xaf0   : > { %v1349_v49 = vsel %vm1348_vm12, %v1764_v18, %v1345_v26 }
 0xaf1   : > { %v1354_v44 = vsel %vm1351_vm13, %v1353_v15, %v1349_v49 }
 0xaf2   : > { %v1357_v32 = vsub.f32 1.0, %v1354_v44  ;;  %v1356_v51 = vmul.f32 %v1354_v44, %v1308_v39 }
 0xaf4   : > { %v1358_v55 = vmul.f32 %v2125_v10, %v1357_v32 }
 0xaf6   : > { %v1359_v38 = vadd.f32 %v1358_v55, %v1356_v51 }
 0xaf8   : > { %1361 = vrot.lane.b32.xlu1 %v1359_v38, %s1850_s12  ;;  %1598 = vmatmul.msk.f32.vlgmr.msra.gmra.mxu3 %vm327_vm1, %v1359_v38 }
 0xb00   : > { %1211 = vrot.lane.b32.xlu1 %v2270_v53, %s1851_s15 }
 0xb6a   : > { %v1362_v57 = vpop.permute.xlu1 %1361 }
 0xb6b   : > { %1364 = vst.msk [vmem:[%s2157_s8 + $0x18] sm:$0xff] %vm759_vm15, %v1362_v57 }
 0xb72   : > { %v1212_v59 = vpop.permute.xlu1 %1211 }
 0xb73   : > { %1214 = vst.msk [vmem:[%s2157_s8 + $0x10] sm:$0xff] %vm811_vm5, %v1212_v59 }
 0xb7b   : > { %v1384_v62 = vpop.f32.mrf.mxu3 }
 0xb7c   : > { %v1387_v0 = vadd.f32 %v1384_v62, %v601_v61 }
 0xb7e   : > { %v1599_v10 = vmul.f32 -1.442695, %v1387_v0 }
 0xb80   : > { %1765 = vpow2.f32 %v1599_v10 }
 0xb86   : > { %v1766_v1 = vpop.eup %1765 }
 0xb87   : > { %v1391_v3 = vadd.f32 1.0, %v1766_v1 }
 0xb89   : > { %1767 = vrcp.f32 %v1391_v3  ;;  %v1403_v53 = vand.u32 2147483648, %v1391_v3  ;;  %v1401_v54 = vand.u32 2147483647, %v1391_v3  ;;  %vm1397_vm14 = vweird.f32 %v1391_v3 }
 0xb8b   : > { %v1404_v16 = vor.u32 1.1754944e-38, %v1403_v53  ;;  %vm1402_vm2 = vcmp.eq.f32.partialorder %v1401_v54, 8.507059e+37 }
 0xb8f   : > { %v1768_v4 = vpop.eup %1767 }
 0xb90   : > { %v1393_v63 = vmul.f32 %v1768_v4, %v1391_v3  ;;  %vm1398_vm15 = vweird.f32 %v1768_v4 }
 0xb91   : > { %vm1399_vm0 = vmor %vm1397_vm14, %vm1398_vm15 }
 0xb92   : > { %v1394_v6 = vsub.f32 1.0, %v1393_v63 }
 0xb94   : > { %v1395_v8 = vmul.f32 %v1768_v4, %v1394_v6 }
 0xb96   : > { %v1396_v13 = vadd.f32 %v1768_v4, %v1395_v8 }
 0xb98   : > { %v1400_v17 = vsel %vm1399_vm0, %v1768_v4, %v1396_v13 }
 0xb99   : > { %v1405_v9 = vsel %vm1402_vm2, %v1404_v16, %v1400_v17 }
 0xb9a   : > { %v1408_v12 = vsub.f32 1.0, %v1405_v9  ;;  %v1407_v19 = vmul.f32 %v1405_v9, %v1359_v38 }
 0xb9c   : > { %v1409_v20 = vmul.f32 %v2129_v11, %v1408_v12 }
 0xb9e   : > { %v1410_v21 = vadd.f32 %v1409_v20, %v1407_v19 }
 0xba0   : > { %1412 = vrot.lane.b32.xlu2 %v1410_v21, %s1851_s15  ;;  %1416 = vst.msk [vmem:[#allocation2] sm:$0xff] %vm327_vm1, %v1410_v21  ;;  %s1789_s15 = scalar_lea.hbm %s2352_s7, 64 }
 0xba1   : > { %p1791_p2 = scmp.lt.s32.totalorder %s1789_s15, %s1785_s10 }
 0xba3   : > { %p1792_p3 = por %p1791_p2, %p1790_p1 }
 0xba5   : > { %p1793_p5 = pnand %p1792_p3, %p1788_p0 }
 0xbfa   : > { %v1413_v29 = vpop.permute.xlu2 %1412 }
 0xbfb   : > { %1415 = vst.msk [vmem:[%s2157_s8 + $0x18] sm:$0xff] %vm811_vm5, %v1413_v29 }
 0xbfc   : > { %1796 = shalt.err (!%p1793_p5)
}
 0xbfd   : > { %1613 = dma.vmem_to_hbm [thread:$0]  (%p1932_p4), %s1434_s21, 512, %s1436_s19, %s1418_s22  }
 0xbfe PF: > { %p1619_p6 = scmp.ge.s32.totalorder %s1847_s29, 2  ;;  %s1447_s23 = sand.u32 1, %s1827_s24  }
 0xbff   : > { %s1448_s8 = scalar_lea.sflag [#allocation4], %s1447_s23 }
 0xc00   : > { %p1616_p7 = pnand %p1619_p6, %p1939_p8 }
 0xc02   : > { %p1617_p9 = pneg %p1616_p7 }
 0xc04   : > { %1822 = dma.done.wait (%p1617_p9), %s1448_s8, 512  }
 0xc05   : > { %1824 = vsyncadd (%p1617_p9), %s1448_s8, 4294966784  ;;  %s20_s29 = sadd.s32 1, %s1847_s29   ;;  %s2355_s24 = smov %s1831_s25 }
 0xc06   : > { %p17_p10 = scmp.ge.s32.totalorder %s20_s29, 4   ;;  %s2356_s25 = smov %s1835_s26 }
 0xc07   : > { %s2357_s26 = smov %s1945_s14  ;;  %s2358_s27 = smov %s1843_s28 }
 0xc08   : > { %s2359_s28 = smov %s2361_s9  ;;  %19 = sbr.rel (!%p17_p10) target bundleno = 4 (0x4), region = 90 }
 0xc0d   :  { %1454 = vsyncpa [#allocation4], 1 }
 0xc0e   :  { %1456 = vsyncpa [#allocation4 + $0x1], 1 }

</bundles_post_ra>
